<compile_context>
chip_gen: v7x
topology: tpu7x:2x2x1
jax: 0.10.0
libtpu: 0.0.40
codegen_flags: <defaults>
</compile_context>

<pallas_src>
import functools

import jax
import jax.numpy as jnp
from jax.experimental import pallas as pl
from jax.experimental.pallas import tpu as pltpu


def attention_kernel(x_ref, wq_ref, wk_ref, wv_ref, wp_ref, b_ref, o_ref,
                     *, num_heads, scale, compute_dtype):
    _, N, C = x_ref.shape
    H = num_heads

    x = x_ref[0]                                                     # (N, C), f32
    # Head-batched view of the activations (leading batch dim = heads).
    xh = jnp.broadcast_to(x.astype(compute_dtype), (H, N, C))        # (H, N, C)

    # --- Q/K/V projections, head-batched; bf16 MXU inputs, f32 accumulation ---
    q = jnp.einsum("hnc,hcd->hnd", xh, wq_ref[...],
                   preferred_element_type=jnp.float32) * scale       # scale folded into q
    k = jnp.einsum("hnc,hcd->hnd", xh, wk_ref[...],
                   preferred_element_type=jnp.float32)
    v = jnp.einsum("hnc,hcd->hnd", xh, wv_ref[...],
                   preferred_element_type=jnp.float32)               # (H, N, Dh)

    # --- attention scores: contraction over head_dim, no explicit transpose of k ---
    s = jnp.einsum("hnd,hmd->hnm",
                   q.astype(compute_dtype), k.astype(compute_dtype),
                   preferred_element_type=jnp.float32)               # (H, N, N)

    # --- numerically stable softmax with deferred normalization ---
    m = jnp.max(s, axis=-1, keepdims=True)                           # (H, N, 1)
    p = jnp.exp(s - m)                                               # unnormalized probs
    l = jnp.sum(p, axis=-1, keepdims=True)                           # (H, N, 1)

    o = jnp.einsum("hnm,hmd->hnd",
                   p.astype(compute_dtype), v.astype(compute_dtype),
                   preferred_element_type=jnp.float32)               # (H, N, Dh)
    o = o * pl.reciprocal(l, approx=False)                           # O(H*N*Dh) normalize

    # --- output projection: per-head slab matmul + sum over heads (no concatenate) ---
    y = jnp.einsum("hnd,hdc->hnc",
                   o.astype(compute_dtype), wp_ref[...],
                   preferred_element_type=jnp.float32)               # (H, N, C)
    y = jnp.sum(y, axis=0) + b_ref[...]                              # (N, C) + (1, C)

    o_ref[0] = y.astype(o_ref.dtype)


def attention(x, torch_weights, *, num_heads, compute_dtype=jnp.bfloat16,
              vmem_limit_bytes=None):
    """x: (B, N, C) float32.

    torch_weights: PyTorch-layout tensors:
      qkv_w (3C, C)  -- nn.Linear(dim, 3*dim, bias=False).weight
      proj_w (C, C)  -- nn.Linear(dim, dim).weight
      proj_b (C,)    -- nn.Linear(dim, dim).bias
    """
    B, N, C = x.shape
    assert C % num_heads == 0
    Dh = C // num_heads
    scale = Dh ** -0.5

    qkv_w = torch_weights["qkv_w"]

    def to_hcd(w):  # (C_out, C_in) -> (H, C_in, Dh): head-major MXU layout (host-side)
        return jnp.transpose(w.reshape(num_heads, Dh, C), (0, 2, 1)).astype(compute_dtype)

    wq = to_hcd(qkv_w[0:C])
    wk = to_hcd(qkv_w[C:2 * C])
    wv = to_hcd(qkv_w[2 * C:3 * C])
    # proj: (C_out, C_in) -> (H, Dh, C_out) so y[n,c] = sum_{h,d} o[h,n,d] * wp[h,d,c]
    wp = jnp.transpose(torch_weights["proj_w"], (1, 0)).reshape(
        num_heads, Dh, C).astype(compute_dtype)
    pb = torch_weights["proj_b"].reshape(1, C).astype(jnp.float32)

    def full_spec(a):
        return pl.BlockSpec(a.shape, lambda b, nd=a.ndim: (0,) * nd)

    kernel = functools.partial(attention_kernel, num_heads=num_heads,
                               scale=scale, compute_dtype=compute_dtype)

    return pl.pallas_call(
        kernel,
        out_shape=jax.ShapeDtypeStruct((B, N, C), x.dtype),
        grid=(B,),
        in_specs=[pl.BlockSpec((1, N, C), lambda b: (b, 0, 0)),
                  full_spec(wq), full_spec(wk), full_spec(wv),
                  full_spec(wp), full_spec(pb)],
        out_specs=pl.BlockSpec((1, N, C), lambda b: (b, 0, 0)),
        compiler_params=pltpu.CompilerParams(
            dimension_semantics=("parallel",),
            vmem_limit_bytes=vmem_limit_bytes),
    )(x, wq, wk, wv, wp, pb)


def init_torch_weights(key, dim):
    k1, k2, k3 = jax.random.split(key, 3)
    std = 0.02
    return {
        "qkv_w": jax.random.normal(k1, (3 * dim, dim), jnp.float32) * std,
        "proj_w": jax.random.normal(k2, (dim, dim), jnp.float32) * std,
        "proj_b": jax.random.normal(k3, (dim,), jnp.float32) * std,
    }


def reference_attention(x, tw, *, num_heads):
    """Pure-JAX float32 replica of the PyTorch Attention.forward (eval mode)."""
    B, N, C = x.shape
    Dh = C // num_heads
    scale = Dh ** -0.5
    hp = jax.lax.Precision.HIGHEST
    qkv = jnp.einsum("bnc,oc->bno", x, tw["qkv_w"], precision=hp)        # bias=False
    qkv = qkv.reshape(B, N, 3, num_heads, Dh).transpose(2, 0, 3, 1, 4)   # (3, B, H, N, Dh)
    q, k, v = qkv[0], qkv[1], qkv[2]
    attn = jnp.einsum("bhnd,bhmd->bhnm", q, k, precision=hp) * scale
    attn = jax.nn.softmax(attn, axis=-1)                                 # attn_drop = id
    o = jnp.einsum("bhnm,bhmd->bhnd", attn, v, precision=hp)
    o = o.transpose(0, 2, 1, 3).reshape(B, N, C)
    return jnp.einsum("bnc,oc->bno", o, tw["proj_w"], precision=hp) + tw["proj_b"]


if __name__ == "__main__":
    # Small but lane-dense shapes: N multiple of 8, C multiple of 128.
    B, N, C = 2, 8, 128
    num_heads = 8                         # head_dim = 16
    key = jax.random.PRNGKey(0)
    kx, kw = jax.random.split(key)
    x = jax.random.normal(kx, (B, N, C), jnp.float32)
    tw = init_torch_weights(kw, C)

    out = attention(x, tw, num_heads=num_heads)              # bf16 MXU inputs, f32 accum
    out = jax.block_until_ready(out)

    ref = reference_attention(x, tw, num_heads=num_heads)    # f32 PyTorch-faithful ref
    assert out.shape == (B, N, C)
    # Tolerance reflects bf16 matmul inputs (f32 accumulation); measured error ~3e-4.
    assert jnp.allclose(out, ref, atol=3e-3, rtol=3e-2), (
        f"mismatch vs reference: max abs err {jnp.max(jnp.abs(out - ref))}")

    print("KERNEL_OK")
</pallas_src>

<mosaic_0001>
module attributes {stable_mosaic.version = 11 : i64} {
  func.func @attention_kernel(%arg0: i32, %arg1: memref<1x8x128xf32, #tpu.memory_space<vmem>>, %arg2: memref<8x128x16xbf16, #tpu.memory_space<vmem>>, %arg3: memref<8x128x16xbf16, #tpu.memory_space<vmem>>, %arg4: memref<8x128x16xbf16, #tpu.memory_space<vmem>>, %arg5: memref<8x16x128xbf16, #tpu.memory_space<vmem>>, %arg6: memref<1x128xf32, #tpu.memory_space<vmem>>, %arg7: memref<1x8x128xf32, #tpu.memory_space<vmem>>) attributes {dimension_semantics = [#tpu.dimension_semantics<parallel>], iteration_bounds = array<i64: 2>, scalar_prefetch = 0 : i64, scratch_operands = 0 : i64, tpu.core_type = #tpu.core_type<tc>, window_params = [{transform_indices = @transform_0, window_bounds = array<i64: 1, 8, 128>}, {pipeline_mode = #tpu.pipeline_mode<synchronous>, transform_indices = @transform_1, window_bounds = array<i64: 8, 128, 16>}, {pipeline_mode = #tpu.pipeline_mode<synchronous>, transform_indices = @transform_2, window_bounds = array<i64: 8, 128, 16>}, {pipeline_mode = #tpu.pipeline_mode<synchronous>, transform_indices = @transform_3, window_bounds = array<i64: 8, 128, 16>}, {pipeline_mode = #tpu.pipeline_mode<synchronous>, transform_indices = @transform_4, window_bounds = array<i64: 8, 16, 128>}, {pipeline_mode = #tpu.pipeline_mode<synchronous>, transform_indices = @transform_5, window_bounds = array<i64: 1, 128>}, {transform_indices = @transform_6, window_bounds = array<i64: 1, 8, 128>}]} {
    %c0 = arith.constant 0 : index
    %c0_0 = arith.constant 0 : index
    %c0_1 = arith.constant 0 : index
    %0 = vector.load %arg1[%c0, %c0_0, %c0_1] : memref<1x8x128xf32, #tpu.memory_space<vmem>>, vector<1x8x128xf32>
    %1 = vector.shape_cast %0 : vector<1x8x128xf32> to vector<8x128xf32>
    %2 = arith.truncf %1 : vector<8x128xf32> to vector<8x128xbf16>
    %3 = vector.shape_cast %2 : vector<8x128xbf16> to vector<1x8x128xbf16>
    %4 = vector.broadcast %3 : vector<1x8x128xbf16> to vector<8x8x128xbf16>
    %c0_2 = arith.constant 0 : index
    %c0_3 = arith.constant 0 : index
    %c0_4 = arith.constant 0 : index
    %5 = vector.load %arg2[%c0_2, %c0_3, %c0_4] : memref<8x128x16xbf16, #tpu.memory_space<vmem>>, vector<8x128x16xbf16>
    "tpu.trace_start"() <{level = 10 : i32, message = "hnc,hcd->hnd"}> : () -> ()
    %cst = arith.constant dense<0.000000e+00> : vector<8x8x16xf32>
    %6 = tpu.matmul %4, %5, %cst {dimension_numbers = #tpu.dot_dimension_numbers<[2], [1], [1], [2], [0, 0, 0, 1, 1, 2], [0], [0]>} : vector<8x8x128xbf16>, vector<8x128x16xbf16>, vector<8x8x16xf32> -> vector<8x8x16xf32>
    "tpu.trace_stop"() : () -> ()
    %cst_5 = arith.constant 2.500000e-01 : f32
    %7 = vector.broadcast %cst_5 : f32 to vector<8x8x16xf32>
    %8 = arith.mulf %6, %7 : vector<8x8x16xf32>
    %c0_6 = arith.constant 0 : index
    %c0_7 = arith.constant 0 : index
    %c0_8 = arith.constant 0 : index
    %9 = vector.load %arg3[%c0_6, %c0_7, %c0_8] : memref<8x128x16xbf16, #tpu.memory_space<vmem>>, vector<8x128x16xbf16>
    "tpu.trace_start"() <{level = 10 : i32, message = "hnc,hcd->hnd"}> : () -> ()
    %cst_9 = arith.constant dense<0.000000e+00> : vector<8x8x16xf32>
    %10 = tpu.matmul %4, %9, %cst_9 {dimension_numbers = #tpu.dot_dimension_numbers<[2], [1], [1], [2], [0, 0, 0, 1, 1, 2], [0], [0]>} : vector<8x8x128xbf16>, vector<8x128x16xbf16>, vector<8x8x16xf32> -> vector<8x8x16xf32>
    "tpu.trace_stop"() : () -> ()
    %c0_10 = arith.constant 0 : index
    %c0_11 = arith.constant 0 : index
    %c0_12 = arith.constant 0 : index
    %11 = vector.load %arg4[%c0_10, %c0_11, %c0_12] : memref<8x128x16xbf16, #tpu.memory_space<vmem>>, vector<8x128x16xbf16>
    "tpu.trace_start"() <{level = 10 : i32, message = "hnc,hcd->hnd"}> : () -> ()
    %cst_13 = arith.constant dense<0.000000e+00> : vector<8x8x16xf32>
    %12 = tpu.matmul %4, %11, %cst_13 {dimension_numbers = #tpu.dot_dimension_numbers<[2], [1], [1], [2], [0, 0, 0, 1, 1, 2], [0], [0]>} : vector<8x8x128xbf16>, vector<8x128x16xbf16>, vector<8x8x16xf32> -> vector<8x8x16xf32>
    "tpu.trace_stop"() : () -> ()
    %13 = arith.truncf %8 : vector<8x8x16xf32> to vector<8x8x16xbf16>
    %14 = arith.truncf %10 : vector<8x8x16xf32> to vector<8x8x16xbf16>
    "tpu.trace_start"() <{level = 10 : i32, message = "hnd,hmd->hnm"}> : () -> ()
    %cst_14 = arith.constant dense<0.000000e+00> : vector<8x8x8xf32>
    %15 = tpu.matmul %13, %14, %cst_14 {dimension_numbers = #tpu.dot_dimension_numbers<[2], [2], [1], [1], [0, 0, 0, 1, 1, 1], [0], [0]>} : vector<8x8x16xbf16>, vector<8x8x16xbf16>, vector<8x8x8xf32> -> vector<8x8x8xf32>
    "tpu.trace_stop"() : () -> ()
    %cst_15 = arith.constant dense<0xFF800000> : vector<8x8xf32>
    %16 = vector.multi_reduction <maximumf>, %15, %cst_15 [2] : vector<8x8x8xf32> to vector<8x8xf32>
    %17 = vector.shape_cast %16 : vector<8x8xf32> to vector<8x8x1xf32>
    %18 = vector.broadcast %17 : vector<8x8x1xf32> to vector<8x8x8xf32>
    %19 = arith.subf %15, %18 : vector<8x8x8xf32>
    %20 = math.exp %19 : vector<8x8x8xf32>
    %cst_16 = arith.constant dense<0.000000e+00> : vector<8x8xf32>
    %21 = vector.multi_reduction <add>, %20, %cst_16 [2] : vector<8x8x8xf32> to vector<8x8xf32>
    %22 = vector.shape_cast %21 : vector<8x8xf32> to vector<8x8x1xf32>
    %23 = arith.truncf %20 : vector<8x8x8xf32> to vector<8x8x8xbf16>
    %24 = arith.truncf %12 : vector<8x8x16xf32> to vector<8x8x16xbf16>
    "tpu.trace_start"() <{level = 10 : i32, message = "hnm,hmd->hnd"}> : () -> ()
    %cst_17 = arith.constant dense<0.000000e+00> : vector<8x8x16xf32>
    %25 = tpu.matmul %23, %24, %cst_17 {dimension_numbers = #tpu.dot_dimension_numbers<[2], [1], [1], [2], [0, 0, 0, 1, 1, 2], [0], [0]>} : vector<8x8x8xbf16>, vector<8x8x16xbf16>, vector<8x8x16xf32> -> vector<8x8x16xf32>
    "tpu.trace_stop"() : () -> ()
    %26 = tpu.reciprocal %22 : vector<8x8x1xf32> -> vector<8x8x1xf32>
    %27 = vector.broadcast %26 : vector<8x8x1xf32> to vector<8x8x16xf32>
    %28 = arith.mulf %25, %27 : vector<8x8x16xf32>
    %29 = arith.truncf %28 : vector<8x8x16xf32> to vector<8x8x16xbf16>
    %c0_18 = arith.constant 0 : index
    %c0_19 = arith.constant 0 : index
    %c0_20 = arith.constant 0 : index
    %30 = vector.load %arg5[%c0_18, %c0_19, %c0_20] : memref<8x16x128xbf16, #tpu.memory_space<vmem>>, vector<8x16x128xbf16>
    "tpu.trace_start"() <{level = 10 : i32, message = "hnd,hdc->hnc"}> : () -> ()
    %cst_21 = arith.constant dense<0.000000e+00> : vector<8x8x128xf32>
    %31 = tpu.matmul %29, %30, %cst_21 {dimension_numbers = #tpu.dot_dimension_numbers<[2], [1], [1], [2], [0, 0, 0, 1, 1, 2], [0], [0]>} : vector<8x8x16xbf16>, vector<8x16x128xbf16>, vector<8x8x128xf32> -> vector<8x8x128xf32>
    "tpu.trace_stop"() : () -> ()
    %cst_22 = arith.constant dense<0.000000e+00> : vector<8x128xf32>
    %32 = vector.multi_reduction <add>, %31, %cst_22 [0] : vector<8x8x128xf32> to vector<8x128xf32>
    %c0_23 = arith.constant 0 : index
    %c0_24 = arith.constant 0 : index
    %33 = vector.load %arg6[%c0_23, %c0_24] : memref<1x128xf32, #tpu.memory_space<vmem>>, vector<1x128xf32>
    %34 = vector.broadcast %33 : vector<1x128xf32> to vector<8x128xf32>
    %35 = arith.addf %32, %34 : vector<8x128xf32>
    %c0_25 = arith.constant 0 : index
    %c0_26 = arith.constant 0 : index
    %c0_27 = arith.constant 0 : index
    %36 = vector.load %arg7[%c0_25, %c0_26, %c0_27] : memref<1x8x128xf32, #tpu.memory_space<vmem>>, vector<1x8x128xf32>
    %37 = vector.shape_cast %36 : vector<1x8x128xf32> to vector<8x128xf32>
    %38 = vector.shape_cast %35 : vector<8x128xf32> to vector<1x8x128xf32>
    tpu.vector_store %arg7[%c0_25, %c0_26, %c0_27], %38 {strides = array<i32>} : memref<1x8x128xf32, #tpu.memory_space<vmem>>, vector<1x8x128xf32>,
    return
  }
  func.func @transform_0(%arg0: i32) -> (i32, i32, i32) {
    %c0_i32 = arith.constant 0 : i32
    %c0_i32_0 = arith.constant 0 : i32
    %c0_i32_1 = arith.constant 0 : i32
    return %arg0, %c0_i32, %c0_i32_0 : i32, i32, i32
  }
  func.func @transform_1(%arg0: i32) -> (i32, i32, i32) {
    %c0_i32 = arith.constant 0 : i32
    %c0_i32_0 = arith.constant 0 : i32
    %c0_i32_1 = arith.constant 0 : i32
    %c0_i32_2 = arith.constant 0 : i32
    return %c0_i32, %c0_i32_0, %c0_i32_1 : i32, i32, i32
  }
  func.func @transform_2(%arg0: i32) -> (i32, i32, i32) {
    %c0_i32 = arith.constant 0 : i32
    %c0_i32_0 = arith.constant 0 : i32
    %c0_i32_1 = arith.constant 0 : i32
    %c0_i32_2 = arith.constant 0 : i32
    return %c0_i32, %c0_i32_0, %c0_i32_1 : i32, i32, i32
  }
  func.func @transform_3(%arg0: i32) -> (i32, i32, i32) {
    %c0_i32 = arith.constant 0 : i32
    %c0_i32_0 = arith.constant 0 : i32
    %c0_i32_1 = arith.constant 0 : i32
    %c0_i32_2 = arith.constant 0 : i32
    return %c0_i32, %c0_i32_0, %c0_i32_1 : i32, i32, i32
  }
  func.func @transform_4(%arg0: i32) -> (i32, i32, i32) {
    %c0_i32 = arith.constant 0 : i32
    %c0_i32_0 = arith.constant 0 : i32
    %c0_i32_1 = arith.constant 0 : i32
    %c0_i32_2 = arith.constant 0 : i32
    return %c0_i32, %c0_i32_0, %c0_i32_1 : i32, i32, i32
  }
  func.func @transform_5(%arg0: i32) -> (i32, i32) {
    %c0_i32 = arith.constant 0 : i32
    %c0_i32_0 = arith.constant 0 : i32
    %c0_i32_1 = arith.constant 0 : i32
    return %c0_i32, %c0_i32_0 : i32, i32
  }
  func.func @transform_6(%arg0: i32) -> (i32, i32, i32) {
    %c0_i32 = arith.constant 0 : i32
    %c0_i32_0 = arith.constant 0 : i32
    %c0_i32_1 = arith.constant 0 : i32
    return %arg0, %c0_i32, %c0_i32_0 : i32, i32, i32
  }
}

</mosaic_0001>

<bundles_post_ra>
// kernel: tpu_custom_call.1
= control target key start
LH: loop header
LB: loop body
LE: loop exit
PB: predicated region body
PF: predicated region fallthrough
CT: control target
= control target key end

     0   :  { %11 = vsyncpa [#allocation3], 0  ;;  %s6781_s0 = inlined_call_operand.vmem [shape: f32[2,8,128], index: 0, kind: input, shape index: {}]   ;;  %s6782_s1 = inlined_call_operand.vmem [shape: bf16[8,128,16], index: 1, kind: input, shape index: {}]   ;;  %s6783_s2 = inlined_call_operand.vmem [shape: bf16[8,128,16], index: 2, kind: input, shape index: {}]   ;;  %s6784_s3 = inlined_call_operand.vmem [shape: bf16[8,128,16], index: 3, kind: input, shape index: {}]   ;;  %s6785_s4 = inlined_call_operand.vmem [shape: bf16[8,16,128], index: 4, kind: input, shape index: {}]   ;;  %s6786_s5 = inlined_call_operand.vmem [shape: f32[1,128], index: 5, kind: input, shape index: {}]   ;;  %s6787_s6 = inlined_call_operand.hbm [shape: f32[2,8,128], index: 6, kind: output, shape index: {}]  }
   0x1   :  { %13 = vsyncpa [#allocation3 + $0x1], 0  ;;  %s5616_s21 = smov 0   ;;  %s5618_s22 = smov 0  }
   0x2   :  { %s5620_s23 = smov 0   ;;  %s5622_s24 = smov 0  }
   0x3 LB: > { %s5637_s25 = sadd.s32 4294967295, %s5576_s24   ;;  %s4118_s26 = sadd.s32 4294967294, %s5576_s24   ;;  %s5576_s24 = sphi %s5622_s24, %s6793_s24   ;;  %s5572_s23 = sphi %s5620_s23, %s6792_s23   ;;  %s5568_s22 = sphi %s5618_s22, %s6791_s22   ;;  %s5564_s21 = sphi %s5616_s21, %s6790_s21  }
   0x4   : > { %s5641_s27 = sadd.s32 1, %s5576_s24   ;;  %s157_s28 = sadd.s32 1, %s5572_s23 }
   0x5   : > { %s154_s29 = ssub.s32 %s5576_s24, %s5641_s27  ;;  %p167_p0 = scmp.ne.s32.totalorder %s5572_s23, %s5568_s22 }
   0x6   : > { %p155_p1 = scmp.eq.s32.totalorder %s154_s29, 0  ;;  %p168_p2 = scmp.eq.s32.totalorder %s5637_s25, 1 }
   0x7   : > { %p173_p3 = scmp.ne.s32.totalorder %s5568_s22, %s5564_s21  ;;  %p174_p4 = scmp.eq.s32.totalorder %s4118_s26, 1 }
   0x8   : > { %s5652_s30 = scalar_select %p155_p1, %s5572_s23, %s157_s28  }
   0x9   : > { %p5654_p5 = por %p168_p2, %p167_p0  ;;  %p5658_p6 = por %p174_p4, %p173_p3 }
   0xa   : > { %p4121_p7 = scmp.ge.s32.totalorder %s5576_s24, 1  ;;  %p214_p8 = scmp.lt.s32.totalorder %s5576_s24, 3 }
   0xc   : > { %p215_p9 = pnand %p4121_p7, %p214_p8 }
   0xd   : > { %v5282_v0 = vld [vmem:[%s6782_s1] sm:$0xff] (!%p215_p9)   ;;  %v5578_v1 = vmov (!%p215_p9), 0.0   ;;  %v5284_v3 = vld [vmem:[%s6782_s1 + $0x8] sm:$0xff] (!%p215_p9)   ;;  %vm5579_vm0 = vmmov (!%p215_p9), 0   ;;  %v5286_v5 = vld [vmem:[%s6782_s1 + $0x10] sm:$0xff] (!%p215_p9)   ;;  %p243_p10 = scmp.lt.s32.totalorder (!%p215_p9), %s5637_s25, 1 }
   0xe   : > { %218 = sbr.rel (%p215_p9) target bundleno = 1312 (0x520), region = 44  ;;  %4617 = vmatprep.subr.bf16.mxu0 (!%p215_p9), %v5578_v1  ;;  %4637 = vmatprep.subr.bf16.mxu1 (!%p215_p9), %v5578_v1  ;;  %v5283_v2 = vld [vmem:[%s6782_s1 + $0x40] sm:$0xff] (!%p215_p9)   ;;  %v5285_v4 = vld [vmem:[%s6782_s1 + $0x48] sm:$0xff] (!%p215_p9)   ;;  %v5287_v6 = vld [vmem:[%s6782_s1 + $0x50] sm:$0xff] (!%p215_p9)   ;;  %vm2770_vm1 = vcmask (!%p215_p9), 130048   ;;  %vm3231_vm2 = vcmask (!%p215_p9), 1043456  }
   0xf   : > { %4618 = vmatpush3.bf16.msra.mxu0 (!%p215_p9), %v5282_v0  ;;  %4633 = vmatprep.mubr.msk.bf16.mxu0 (!%p215_p9), %vm5579_vm0, %v5578_v1  ;;  %v5288_v7 = vld [vmem:[%s6782_s1 + $0x18] sm:$0xff] (!%p215_p9)   ;;  %v5290_v9 = vld [vmem:[%s6782_s1 + $0x20] sm:$0xff] (!%p215_p9)   ;;  %v5292_v11 = vld [vmem:[%s6782_s1 + $0x28] sm:$0xff] (!%p215_p9)   ;;  %vm3139_vm3 = vcmask (!%p215_p9), 64512   ;;  %s240_s9 = sand.u32 (!%p215_p9), 1, %s5568_s22   ;;  %s4350_s13 = sshll.u32 (!%p215_p9), %s5637_s25, 7 }
  0x10   : > { %4638 = vmatpush3.bf16.msra.mxu1 (!%p215_p9), %v5283_v2  ;;  %4619 = vmatprep.subr.bf16.mxu0 (!%p215_p9), %v5578_v1  ;;  %v5289_v8 = vld [vmem:[%s6782_s1 + $0x58] sm:$0xff] (!%p215_p9)   ;;  %v5291_v10 = vld [vmem:[%s6782_s1 + $0x60] sm:$0xff] (!%p215_p9)   ;;  %v5293_v12 = vld [vmem:[%s6782_s1 + $0x68] sm:$0xff] (!%p215_p9)   ;;  %s4122_s10 = sshll.u32 (!%p215_p9), %s240_s9, 3  ;;  %s6739_s18 = scalar_lea.hbm (!%p215_p9), %s6787_s6, %s4350_s13 }
  0x11   : > { %4639 = vmatprep.subr.bf16.mxu1 (!%p215_p9), %v5578_v1  ;;  %4653 = vmatprep.mubr.msk.bf16.mxu1 (!%p215_p9), %vm5579_vm0, %v5578_v1  ;;  %v5294_v13 = vld [vmem:[%s6782_s1 + $0x30] sm:$0xff] (!%p215_p9)   ;;  %v5296_v15 = vld [vmem:[%s6782_s1 + $0x38] sm:$0xff] (!%p215_p9)   ;;  %v5298_v19 = vld [vmem:[%s6782_s1 + $0x80] sm:$0xff] (!%p215_p9)   ;;  %s5580_s20 = smov (!%p215_p9), [#allocation2]  }
  0x12   : > { %v5295_v14 = vld [vmem:[%s6782_s1 + $0x70] sm:$0xff] (!%p215_p9)   ;;  %v5297_v17 = vld [vmem:[%s6782_s1 + $0x78] sm:$0xff] (!%p215_p9)   ;;  %v5299_v20 = vld [vmem:[%s6782_s1 + $0xc0] sm:$0xff] (!%p215_p9)   ;;  %s5518_s26 = sshll.u32 (!%p215_p9), %s5580_s20, 4  ;;  %s5519_s26 = int_to_ptr.vmem [resolvable:$false] %s5518_s26 }
  0x13   : > { %4620 = vmatpush3.bf16.msra.mxu0 (!%p215_p9), %v5284_v3  ;;  %v5300_v21 = vld [vmem:[%s6782_s1 + $0x88] sm:$0xff] (!%p215_p9)   ;;  %v5302_v23 = vld [vmem:[%s6782_s1 + $0x90] sm:$0xff] (!%p215_p9)   ;;  %v5304_v25 = vld [vmem:[%s6782_s1 + $0x98] sm:$0xff] (!%p215_p9)   ;;  %s5520_s28 = scalar_lea.vmem (!%p215_p9), %s5519_s26, 256 }
  0x14   : > { %4640 = vmatpush3.bf16.msra.mxu1 (!%p215_p9), %v5285_v4  ;;  %4621 = vmatprep.subr.bf16.mxu0 (!%p215_p9), %v5578_v1  ;;  %v5301_v22 = vld [vmem:[%s6782_s1 + $0xc8] sm:$0xff] (!%p215_p9)   ;;  %v5303_v24 = vld [vmem:[%s6782_s1 + $0xd0] sm:$0xff] (!%p215_p9)   ;;  %v5305_v26 = vld [vmem:[%s6782_s1 + $0xd8] sm:$0xff] (!%p215_p9)  }
  0x15   : > { %4641 = vmatprep.subr.bf16.mxu1 %v5578_v1  ;;  %s244_s14 = scalar_select %p243_p10, %s5637_s25, 1  ;;  %v5306_v27 = vld [vmem:[%s6782_s1 + $0xa0] sm:$0xff]   ;;  %v5308_v29 = vld [vmem:[%s6782_s1 + $0xa8] sm:$0xff]   ;;  %v5310_v31 = vld [vmem:[%s6782_s1 + $0xb0] sm:$0xff]  }
  0x16   : > { %v5307_v28 = vld [vmem:[%s6782_s1 + $0xe0] sm:$0xff]   ;;  %v5309_v30 = vld [vmem:[%s6782_s1 + $0xe8] sm:$0xff]   ;;  %v5311_v32 = vld [vmem:[%s6782_s1 + $0xf0] sm:$0xff]  }
  0x17   : > { %4622 = vmatpush3.bf16.msra.mxu0 %v5286_v5  ;;  %s4123_s19 = sshll.u32 %s244_s14, 3  ;;  %v5312_v33 = vld [vmem:[%s6782_s1 + $0xb8] sm:$0xff]   ;;  %v5314_v35 = vld [vmem:[%s6782_s1 + $0x100] sm:$0xff]   ;;  %v5316_v37 = vld [vmem:[%s6782_s1 + $0x108] sm:$0xff]   ;;  %s242_s14 = scalar_lea.vmem [#allocation2], %s4122_s10 }
  0x18   : > { %4642 = vmatpush3.bf16.msra.mxu1 %v5287_v6  ;;  %4623 = vmatprep.subr.bf16.mxu0 %v5578_v1  ;;  %s246_s11 = scalar_lea.vmem %s6781_s0, %s4123_s19  ;;  %v5313_v34 = vld [vmem:[%s6782_s1 + $0xf8] sm:$0xff]   ;;  %v5315_v36 = vld [vmem:[%s6782_s1 + $0x140] sm:$0xff]   ;;  %v5317_v38 = vld [vmem:[%s6782_s1 + $0x148] sm:$0xff]   ;;  %s4059_s15 = sshll.u32 %s242_s14, 4  ;;  %s6741_s15 = int_to_ptr.vmem [resolvable:$true] %s4059_s15 }
  0x19   : > { %4643 = vmatprep.subr.bf16.mxu1 %v5578_v1  ;;  %v248_v16 = vld [vmem:[%s246_s11] sm:$0xff]  ;;  %v5318_v39 = vld [vmem:[%s6782_s1 + $0x110] sm:$0xff]   ;;  %v5320_v41 = vld [vmem:[%s6782_s1 + $0x118] sm:$0xff]   ;;  %s4046_s19 = scalar_lea.sflag [#allocation3], %s240_s9  ;;  %s5514_s25 = scalar_lea.vmem %s6741_s15, 128 }
  0x1a   : > { %v5737_v18 = vpack.c.bf16 %v248_v16, %v248_v16  ;;  %v5319_v40 = vld [vmem:[%s6782_s1 + $0x150] sm:$0xff]   ;;  %v5321_v42 = vld [vmem:[%s6782_s1 + $0x158] sm:$0xff]   ;;  %v5322_v43 = vld [vmem:[%s6782_s1 + $0x120] sm:$0xff]   ;;  %p5515_p11 = scmp.ne.s32.totalorder %s6741_s15, %s5514_s25  ;;  %p5521_p0 = scmp.lt.s32.totalorder %s6741_s15, %s5519_s26 }
  0x1b   : > { %4624 = vmatpush3.bf16.msra.mxu0 %v5288_v7  ;;  %v5323_v44 = vld [vmem:[%s6782_s1 + $0x160] sm:$0xff]   ;;  %v5324_v45 = vld [vmem:[%s6782_s1 + $0x128] sm:$0xff]   ;;  %v5326_v47 = vld [vmem:[%s6782_s1 + $0x130] sm:$0xff]   ;;  %p5522_p1 = scmp.lt.s32.totalorder %s5520_s28, %s5514_s25 }
  0x1c   : > { %4644 = vmatpush3.bf16.msra.mxu1 %v5289_v8  ;;  %4625 = vmatprep.subr.bf16.mxu0 %v5578_v1  ;;  %v5325_v46 = vld [vmem:[%s6782_s1 + $0x168] sm:$0xff]   ;;  %v5327_v48 = vld [vmem:[%s6782_s1 + $0x170] sm:$0xff]   ;;  %v5328_v49 = vld [vmem:[%s6782_s1 + $0x138] sm:$0xff]   ;;  %p5516_p12 = pnand %p5515_p11, %p5654_p5 }
  0x1d   : > { %4645 = vmatprep.subr.bf16.mxu1 %v5578_v1  ;;  %v5329_v50 = vld [vmem:[%s6782_s1 + $0x178] sm:$0xff]   ;;  %v5330_v51 = vld [vmem:[%s6782_s1 + $0x180] sm:$0xff]   ;;  %v5332_v53 = vld [vmem:[%s6782_s1 + $0x188] sm:$0xff]   ;;  %p5523_p2 = por %p5522_p1, %p5521_p0 }
  0x1e   : > { %v5331_v52 = vld [vmem:[%s6782_s1 + $0x1c0] sm:$0xff]   ;;  %v5333_v54 = vld [vmem:[%s6782_s1 + $0x1c8] sm:$0xff]   ;;  %v5334_v55 = vld [vmem:[%s6782_s1 + $0x190] sm:$0xff]   ;;  %p5517_p13 = pneg %p5516_p12 }
  0x1f   : > { %4626 = vmatpush3.bf16.msra.mxu0 %v5290_v9  ;;  %v5335_v56 = vld [vmem:[%s6782_s1 + $0x1d0] sm:$0xff]   ;;  %v5336_v57 = vld [vmem:[%s6782_s1 + $0x198] sm:$0xff]   ;;  %v5338_v59 = vld [vmem:[%s6782_s1 + $0x1a0] sm:$0xff]  }
  0x20   : > { %4646 = vmatpush3.bf16.msra.mxu1 %v5291_v10  ;;  %4627 = vmatprep.subr.bf16.mxu0 %v5578_v1  ;;  %v5337_v58 = vld [vmem:[%s6782_s1 + $0x1d8] sm:$0xff]   ;;  %v5339_v60 = vld [vmem:[%s6782_s1 + $0x1e0] sm:$0xff]   ;;  %v5340_v61 = vld [vmem:[%s6782_s1 + $0x1a8] sm:$0xff]   ;;  %p5524_p3 = pnand %p5523_p2, %p5517_p13 }
  0x21   : > { %4647 = vmatprep.subr.bf16.mxu1 %v5578_v1  ;;  %v5341_v62 = vld [vmem:[%s6782_s1 + $0x1e8] sm:$0xff]   ;;  %v5342_v63 = vld [vmem:[%s6782_s1 + $0x1b0] sm:$0xff]   ;;  %v5344_v2 = vld [vmem:[%s6782_s1 + $0x1b8] sm:$0xff]  }
  0x22   : > { %v5343_v0 = vld [vmem:[%s6782_s1 + $0x1f0] sm:$0xff]   ;;  %v5345_v3 = vld [vmem:[%s6782_s1 + $0x1f8] sm:$0xff]   ;;  %v5346_v4 = vld [vmem:[%s6783_s2] sm:$0xff]  }
  0x23   : > { %4628 = vmatpush3.bf16.msra.mxu0 %v5292_v11  ;;  %v5347_v5 = vld [vmem:[%s6783_s2 + $0x40] sm:$0xff]   ;;  %v5348_v6 = vld [vmem:[%s6783_s2 + $0x8] sm:$0xff]   ;;  %v5350_v8 = vld [vmem:[%s6783_s2 + $0x10] sm:$0xff]  }
  0x24   : > { %4648 = vmatpush3.bf16.msra.mxu1 %v5293_v12  ;;  %4629 = vmatprep.subr.bf16.mxu0 %v5578_v1  ;;  %v5349_v7 = vld [vmem:[%s6783_s2 + $0x48] sm:$0xff]   ;;  %v5351_v9 = vld [vmem:[%s6783_s2 + $0x50] sm:$0xff]   ;;  %v5352_v10 = vld [vmem:[%s6783_s2 + $0x18] sm:$0xff]  }
  0x25   : > { %4649 = vmatprep.subr.bf16.mxu1 %v5578_v1  ;;  %v5353_v11 = vld [vmem:[%s6783_s2 + $0x58] sm:$0xff]   ;;  %v5354_v12 = vld [vmem:[%s6783_s2 + $0x20] sm:$0xff]   ;;  %v5358_v16 = vld [vmem:[%s6783_s2 + $0x30] sm:$0xff]  }
  0x27   : > { %4630 = vmatpush3.bf16.msra.mxu0 %v5294_v13  ;;  %v5355_v13 = vld [vmem:[%s6783_s2 + $0x60] sm:$0xff]  }
  0x28   : > { %4650 = vmatpush3.bf16.msra.mxu1 %v5295_v14  ;;  %4631 = vmatprep.subr.bf16.mxu0 %v5578_v1  ;;  %v5356_v14 = vld [vmem:[%s6783_s2 + $0x28] sm:$0xff]  }
  0x29   : > { %4651 = vmatprep.subr.bf16.mxu1 %v5578_v1 }
  0x2b   : > { %4632 = vmatpush3.bf16.msra.mxu0 %v5296_v15  ;;  %v5357_v15 = vld [vmem:[%s6783_s2 + $0x68] sm:$0xff]  }
  0x2c   : > { %4652 = vmatpush3.bf16.msra.mxu1 %v5297_v17  ;;  %4657 = vmatprep.subr.bf16.mxu0 %v5578_v1  ;;  %v5359_v17 = vld [vmem:[%s6783_s2 + $0x70] sm:$0xff]  }
  0x2d   : > { %4677 = vmatprep.subr.bf16.mxu1 %v5578_v1 }
  0x2e   : > { %4634 = vmatmul.mubr.bf16.vlgmr.msra.gmra.mrb[0].mxu0 %v5737_v18 }
  0x2f   : > { %4654 = vmatmul.mubr.bf16.vlgmr.msra.gmra.mrb[0].mxu1 %v5737_v18  ;;  %4658 = vmatpush3.bf16.msra.mxu0 %v5298_v19  ;;  %v5360_v19 = vld [vmem:[%s6783_s2 + $0x38] sm:$0xff]  }
  0x30   : > { %4678 = vmatpush3.bf16.msra.mxu1 %v5299_v20  ;;  %4659 = vmatprep.subr.bf16.mxu0 %v5578_v1  ;;  %v5361_v20 = vld [vmem:[%s6783_s2 + $0x78] sm:$0xff]  }
  0x31   : > { %4679 = vmatprep.subr.bf16.mxu1 %v5578_v1  ;;  %4673 = vmatprep.mubr.msk.bf16.mxu0 %vm5579_vm0, %v5578_v1 }
  0x32   : > { %4693 = vmatprep.mubr.msk.bf16.mxu1 %vm5579_vm0, %v5578_v1 }
  0x33   : > { %4660 = vmatpush3.bf16.msra.mxu0 %v5300_v21  ;;  %v5362_v21 = vld [vmem:[%s6783_s2 + $0x80] sm:$0xff]  }
  0x34   : > { %4680 = vmatpush3.bf16.msra.mxu1 %v5301_v22  ;;  %4661 = vmatprep.subr.bf16.mxu0 %v5578_v1  ;;  %v5363_v22 = vld [vmem:[%s6783_s2 + $0xc0] sm:$0xff]  }
  0x35   : > { %4681 = vmatprep.subr.bf16.mxu1 %v5578_v1 }
  0x37   : > { %4662 = vmatpush3.bf16.msra.mxu0 %v5302_v23  ;;  %v5364_v23 = vld [vmem:[%s6783_s2 + $0x88] sm:$0xff]  }
  0x38   : > { %4682 = vmatpush3.bf16.msra.mxu1 %v5303_v24  ;;  %4663 = vmatprep.subr.bf16.mxu0 %v5578_v1  ;;  %v5365_v24 = vld [vmem:[%s6783_s2 + $0xc8] sm:$0xff]  }
  0x39   : > { %4683 = vmatprep.subr.bf16.mxu1 %v5578_v1 }
  0x3b   : > { %4664 = vmatpush3.bf16.msra.mxu0 %v5304_v25  ;;  %v5366_v25 = vld [vmem:[%s6783_s2 + $0x90] sm:$0xff]  }
  0x3c   : > { %4684 = vmatpush3.bf16.msra.mxu1 %v5305_v26  ;;  %4665 = vmatprep.subr.bf16.mxu0 %v5578_v1  ;;  %v5367_v26 = vld [vmem:[%s6783_s2 + $0xd0] sm:$0xff]  }
  0x3d   : > { %4685 = vmatprep.subr.bf16.mxu1 %v5578_v1 }
  0x3f   : > { %4666 = vmatpush3.bf16.msra.mxu0 %v5306_v27  ;;  %v5368_v27 = vld [vmem:[%s6783_s2 + $0x98] sm:$0xff]  }
  0x40   : > { %4686 = vmatpush3.bf16.msra.mxu1 %v5307_v28  ;;  %4667 = vmatprep.subr.bf16.mxu0 %v5578_v1  ;;  %v5369_v28 = vld [vmem:[%s6783_s2 + $0xd8] sm:$0xff]  }
  0x41   : > { %4687 = vmatprep.subr.bf16.mxu1 %v5578_v1 }
  0x43   : > { %4668 = vmatpush3.bf16.msra.mxu0 %v5308_v29  ;;  %v5370_v29 = vld [vmem:[%s6783_s2 + $0xa0] sm:$0xff]  }
  0x44   : > { %4688 = vmatpush3.bf16.msra.mxu1 %v5309_v30  ;;  %4669 = vmatprep.subr.bf16.mxu0 %v5578_v1  ;;  %v5371_v30 = vld [vmem:[%s6783_s2 + $0xe0] sm:$0xff]  }
  0x45   : > { %4689 = vmatprep.subr.bf16.mxu1 %v5578_v1 }
  0x47   : > { %4670 = vmatpush3.bf16.msra.mxu0 %v5310_v31  ;;  %v5372_v31 = vld [vmem:[%s6783_s2 + $0xa8] sm:$0xff]  }
  0x48   : > { %4690 = vmatpush3.bf16.msra.mxu1 %v5311_v32  ;;  %4671 = vmatprep.subr.bf16.mxu0 %v5578_v1  ;;  %v5373_v32 = vld [vmem:[%s6783_s2 + $0xe8] sm:$0xff]  }
  0x49   : > { %4691 = vmatprep.subr.bf16.mxu1 %v5578_v1 }
  0x4b   : > { %4672 = vmatpush3.bf16.msra.mxu0 %v5312_v33  ;;  %v5374_v33 = vld [vmem:[%s6783_s2 + $0xb0] sm:$0xff]  }
  0x4c   : > { %4692 = vmatpush3.bf16.msra.mxu1 %v5313_v34  ;;  %4697 = vmatprep.subr.bf16.mxu0 %v5578_v1  ;;  %v5375_v34 = vld [vmem:[%s6783_s2 + $0xf0] sm:$0xff]  }
  0x4d   : > { %4717 = vmatprep.subr.bf16.mxu1 %v5578_v1 }
  0x4e   : > { %4674 = vmatmul.mubr.bf16.vlgmr.msra.gmra.mrb[4].mxu0 %v5737_v18 }
  0x4f   : > { %4694 = vmatmul.mubr.bf16.vlgmr.msra.gmra.mrb[4].mxu1 %v5737_v18  ;;  %4698 = vmatpush3.bf16.msra.mxu0 %v5314_v35  ;;  %v5376_v35 = vld [vmem:[%s6783_s2 + $0xb8] sm:$0xff]  }
  0x50   : > { %4718 = vmatpush3.bf16.msra.mxu1 %v5315_v36  ;;  %4699 = vmatprep.subr.bf16.mxu0 %v5578_v1  ;;  %v5377_v36 = vld [vmem:[%s6783_s2 + $0xf8] sm:$0xff]  }
  0x51   : > { %4719 = vmatprep.subr.bf16.mxu1 %v5578_v1  ;;  %4713 = vmatprep.mubr.msk.bf16.mxu0 %vm5579_vm0, %v5578_v1 }
  0x52   : > { %4733 = vmatprep.mubr.msk.bf16.mxu1 %vm5579_vm0, %v5578_v1 }
  0x53   : > { %4700 = vmatpush3.bf16.msra.mxu0 %v5316_v37  ;;  %v5378_v37 = vld [vmem:[%s6783_s2 + $0x100] sm:$0xff]  }
  0x54   : > { %4720 = vmatpush3.bf16.msra.mxu1 %v5317_v38  ;;  %4701 = vmatprep.subr.bf16.mxu0 %v5578_v1  ;;  %v5379_v38 = vld [vmem:[%s6783_s2 + $0x140] sm:$0xff]  }
  0x55   : > { %4721 = vmatprep.subr.bf16.mxu1 %v5578_v1 }
  0x57   : > { %4702 = vmatpush3.bf16.msra.mxu0 %v5318_v39  ;;  %v5380_v39 = vld [vmem:[%s6783_s2 + $0x108] sm:$0xff]  }
  0x58   : > { %4722 = vmatpush3.bf16.msra.mxu1 %v5319_v40  ;;  %4703 = vmatprep.subr.bf16.mxu0 %v5578_v1  ;;  %v5381_v40 = vld [vmem:[%s6783_s2 + $0x148] sm:$0xff]  }
  0x59   : > { %4723 = vmatprep.subr.bf16.mxu1 %v5578_v1 }
  0x5b   : > { %4704 = vmatpush3.bf16.msra.mxu0 %v5320_v41  ;;  %v5382_v41 = vld [vmem:[%s6783_s2 + $0x110] sm:$0xff]  }
  0x5c   : > { %4724 = vmatpush3.bf16.msra.mxu1 %v5321_v42  ;;  %4705 = vmatprep.subr.bf16.mxu0 %v5578_v1  ;;  %v5383_v42 = vld [vmem:[%s6783_s2 + $0x150] sm:$0xff]  }
  0x5d   : > { %4725 = vmatprep.subr.bf16.mxu1 %v5578_v1 }
  0x5f   : > { %4706 = vmatpush3.bf16.msra.mxu0 %v5322_v43  ;;  %v5384_v43 = vld [vmem:[%s6783_s2 + $0x118] sm:$0xff]  }
  0x60   : > { %4726 = vmatpush3.bf16.msra.mxu1 %v5323_v44  ;;  %4707 = vmatprep.subr.bf16.mxu0 %v5578_v1  ;;  %v5385_v44 = vld [vmem:[%s6783_s2 + $0x158] sm:$0xff]  }
  0x61   : > { %4727 = vmatprep.subr.bf16.mxu1 %v5578_v1 }
  0x63   : > { %4708 = vmatpush3.bf16.msra.mxu0 %v5324_v45  ;;  %v5386_v45 = vld [vmem:[%s6783_s2 + $0x120] sm:$0xff]  }
  0x64   : > { %4728 = vmatpush3.bf16.msra.mxu1 %v5325_v46  ;;  %4709 = vmatprep.subr.bf16.mxu0 %v5578_v1  ;;  %v5387_v46 = vld [vmem:[%s6783_s2 + $0x160] sm:$0xff]  }
  0x65   : > { %4729 = vmatprep.subr.bf16.mxu1 %v5578_v1 }
  0x67   : > { %4710 = vmatpush3.bf16.msra.mxu0 %v5326_v47  ;;  %v5388_v47 = vld [vmem:[%s6783_s2 + $0x128] sm:$0xff]  }
  0x68   : > { %4730 = vmatpush3.bf16.msra.mxu1 %v5327_v48  ;;  %4711 = vmatprep.subr.bf16.mxu0 %v5578_v1  ;;  %v5389_v48 = vld [vmem:[%s6783_s2 + $0x168] sm:$0xff]  }
  0x69   : > { %4731 = vmatprep.subr.bf16.mxu1 %v5578_v1 }
  0x6b   : > { %4712 = vmatpush3.bf16.msra.mxu0 %v5328_v49  ;;  %v5390_v49 = vld [vmem:[%s6783_s2 + $0x130] sm:$0xff]  }
  0x6c   : > { %4732 = vmatpush3.bf16.msra.mxu1 %v5329_v50  ;;  %4737 = vmatprep.subr.bf16.mxu0 %v5578_v1  ;;  %v5391_v50 = vld [vmem:[%s6783_s2 + $0x170] sm:$0xff]  }
  0x6d   : > { %4757 = vmatprep.subr.bf16.mxu1 %v5578_v1 }
  0x6e   : > { %4714 = vmatmul.mubr.bf16.vlgmr.msra.gmra.mrb[8].mxu0 %v5737_v18 }
  0x6f   : > { %4734 = vmatmul.mubr.bf16.vlgmr.msra.gmra.mrb[8].mxu1 %v5737_v18  ;;  %4738 = vmatpush3.bf16.msra.mxu0 %v5330_v51  ;;  %v5392_v51 = vld [vmem:[%s6783_s2 + $0x138] sm:$0xff]  }
  0x70   : > { %4758 = vmatpush3.bf16.msra.mxu1 %v5331_v52  ;;  %4739 = vmatprep.subr.bf16.mxu0 %v5578_v1  ;;  %v5393_v52 = vld [vmem:[%s6783_s2 + $0x178] sm:$0xff]  }
  0x71   : > { %4759 = vmatprep.subr.bf16.mxu1 %v5578_v1  ;;  %4753 = vmatprep.mubr.msk.bf16.mxu0 %vm5579_vm0, %v5578_v1 }
  0x72   : > { %4773 = vmatprep.mubr.msk.bf16.mxu1 %vm5579_vm0, %v5578_v1 }
  0x73   : > { %4740 = vmatpush3.bf16.msra.mxu0 %v5332_v53  ;;  %v5394_v53 = vld [vmem:[%s6783_s2 + $0x180] sm:$0xff]  }
  0x74   : > { %4760 = vmatpush3.bf16.msra.mxu1 %v5333_v54  ;;  %4741 = vmatprep.subr.bf16.mxu0 %v5578_v1  ;;  %v5395_v54 = vld [vmem:[%s6783_s2 + $0x1c0] sm:$0xff]  }
  0x75   : > { %4761 = vmatprep.subr.bf16.mxu1 %v5578_v1 }
  0x77   : > { %4742 = vmatpush3.bf16.msra.mxu0 %v5334_v55  ;;  %v5396_v55 = vld [vmem:[%s6783_s2 + $0x188] sm:$0xff]  }
  0x78   : > { %4762 = vmatpush3.bf16.msra.mxu1 %v5335_v56  ;;  %4743 = vmatprep.subr.bf16.mxu0 %v5578_v1  ;;  %v5397_v56 = vld [vmem:[%s6783_s2 + $0x1c8] sm:$0xff]  }
  0x79   : > { %4763 = vmatprep.subr.bf16.mxu1 %v5578_v1 }
  0x7b   : > { %4744 = vmatpush3.bf16.msra.mxu0 %v5336_v57  ;;  %v5398_v57 = vld [vmem:[%s6783_s2 + $0x190] sm:$0xff]  }
  0x7c   : > { %4764 = vmatpush3.bf16.msra.mxu1 %v5337_v58  ;;  %4745 = vmatprep.subr.bf16.mxu0 %v5578_v1  ;;  %v5399_v58 = vld [vmem:[%s6783_s2 + $0x1d0] sm:$0xff]  }
  0x7d   : > { %4765 = vmatprep.subr.bf16.mxu1 %v5578_v1 }
  0x7f   : > { %4746 = vmatpush3.bf16.msra.mxu0 %v5338_v59  ;;  %v5400_v59 = vld [vmem:[%s6783_s2 + $0x198] sm:$0xff]  }
  0x80   : > { %4766 = vmatpush3.bf16.msra.mxu1 %v5339_v60  ;;  %4747 = vmatprep.subr.bf16.mxu0 %v5578_v1  ;;  %v5401_v60 = vld [vmem:[%s6783_s2 + $0x1d8] sm:$0xff]  }
  0x81   : > { %4767 = vmatprep.subr.bf16.mxu1 %v5578_v1 }
  0x83   : > { %4748 = vmatpush3.bf16.msra.mxu0 %v5340_v61  ;;  %v5402_v61 = vld [vmem:[%s6783_s2 + $0x1a0] sm:$0xff]  }
  0x84   : > { %4768 = vmatpush3.bf16.msra.mxu1 %v5341_v62  ;;  %4749 = vmatprep.subr.bf16.mxu0 %v5578_v1  ;;  %v5403_v62 = vld [vmem:[%s6783_s2 + $0x1e0] sm:$0xff]  }
  0x85   : > { %4769 = vmatprep.subr.bf16.mxu1 %v5578_v1 }
  0x87   : > { %4750 = vmatpush3.bf16.msra.mxu0 %v5342_v63  ;;  %v5404_v63 = vld [vmem:[%s6783_s2 + $0x1a8] sm:$0xff]  }
  0x88   : > { %4770 = vmatpush3.bf16.msra.mxu1 %v5343_v0  ;;  %4751 = vmatprep.subr.bf16.mxu0 %v5578_v1  ;;  %v5405_v0 = vld [vmem:[%s6783_s2 + $0x1e8] sm:$0xff]  }
  0x89   : > { %4771 = vmatprep.subr.bf16.mxu1 %v5578_v1 }
  0x8b   : > { %4752 = vmatpush3.bf16.msra.mxu0 %v5344_v2 }
  0x8c   : > { %4772 = vmatpush3.bf16.msra.mxu1 %v5345_v3  ;;  %4777 = vmatprep.subr.bf16.mxu0 %v5578_v1 }
  0x8d   : > { %4797 = vmatprep.subr.bf16.mxu1 %v5578_v1 }
  0x8e   : > { %4754 = vmatmul.mubr.bf16.vlgmr.msra.gmra.mrb[12].mxu0 %v5737_v18 }
  0x8f   : > { %4774 = vmatmul.mubr.bf16.vlgmr.msra.gmra.mrb[12].mxu1 %v5737_v18  ;;  %4778 = vmatpush3.bf16.msra.mxu0 %v5346_v4 }
  0x90   : > { %4798 = vmatpush3.bf16.msra.mxu1 %v5347_v5  ;;  %4779 = vmatprep.subr.bf16.mxu0 %v5578_v1 }
  0x91   : > { %4799 = vmatprep.subr.bf16.mxu1 %v5578_v1  ;;  %4793 = vmatprep.mubr.msk.bf16.mxu0 %vm5579_vm0, %v5578_v1 }
  0x92   : > { %4813 = vmatprep.mubr.msk.bf16.mxu1 %vm5579_vm0, %v5578_v1 }
  0x93   : > { %4780 = vmatpush3.bf16.msra.mxu0 %v5348_v6 }
  0x94   : > { %4800 = vmatpush3.bf16.msra.mxu1 %v5349_v7  ;;  %4781 = vmatprep.subr.bf16.mxu0 %v5578_v1  ;;  %v5406_v7 = vld [vmem:[%s6783_s2 + $0x1b0] sm:$0xff]  }
  0x95   : > { %4801 = vmatprep.subr.bf16.mxu1 %v5578_v1 }
  0x97   : > { %4782 = vmatpush3.bf16.msra.mxu0 %v5350_v8 }
  0x98   : > { %4802 = vmatpush3.bf16.msra.mxu1 %v5351_v9  ;;  %4783 = vmatprep.subr.bf16.mxu0 %v5578_v1 }
  0x99   : > { %4803 = vmatprep.subr.bf16.mxu1 %v5578_v1 }
  0x9b   : > { %4784 = vmatpush3.bf16.msra.mxu0 %v5352_v10  ;;  %v5407_v10 = vld [vmem:[%s6783_s2 + $0x1f0] sm:$0xff]  }
  0x9c   : > { %4804 = vmatpush3.bf16.msra.mxu1 %v5353_v11  ;;  %4785 = vmatprep.subr.bf16.mxu0 %v5578_v1 }
  0x9d   : > { %4805 = vmatprep.subr.bf16.mxu1 %v5578_v1 }
  0x9f   : > { %4786 = vmatpush3.bf16.msra.mxu0 %v5354_v12  ;;  %v5408_v12 = vld [vmem:[%s6783_s2 + $0x1b8] sm:$0xff]  }
  0xa0   : > { %4806 = vmatpush3.bf16.msra.mxu1 %v5355_v13  ;;  %4787 = vmatprep.subr.bf16.mxu0 %v5578_v1  ;;  %v5409_v13 = vld [vmem:[%s6783_s2 + $0x1f8] sm:$0xff]  }
  0xa1   : > { %4807 = vmatprep.subr.bf16.mxu1 %v5578_v1 }
  0xa3   : > { %4788 = vmatpush3.bf16.msra.mxu0 %v5356_v14  ;;  %v5410_v14 = vld [vmem:[%s6784_s3] sm:$0xff]  }
  0xa4   : > { %4808 = vmatpush3.bf16.msra.mxu1 %v5357_v15  ;;  %4789 = vmatprep.subr.bf16.mxu0 %v5578_v1  ;;  %v5411_v15 = vld [vmem:[%s6784_s3 + $0x40] sm:$0xff]  }
  0xa5   : > { %4809 = vmatprep.subr.bf16.mxu1 %v5578_v1 }
  0xa7   : > { %4790 = vmatpush3.bf16.msra.mxu0 %v5358_v16  ;;  %v5412_v16 = vld [vmem:[%s6784_s3 + $0x8] sm:$0xff]  }
  0xa8   : > { %4810 = vmatpush3.bf16.msra.mxu1 %v5359_v17  ;;  %4791 = vmatprep.subr.bf16.mxu0 %v5578_v1  ;;  %v5413_v17 = vld [vmem:[%s6784_s3 + $0x48] sm:$0xff]  }
  0xa9   : > { %4811 = vmatprep.subr.bf16.mxu1 %v5578_v1 }
  0xab   : > { %4792 = vmatpush3.bf16.msra.mxu0 %v5360_v19  ;;  %v5414_v19 = vld [vmem:[%s6784_s3 + $0x10] sm:$0xff]  }
  0xac   : > { %4812 = vmatpush3.bf16.msra.mxu1 %v5361_v20  ;;  %4817 = vmatprep.subr.bf16.mxu0 %v5578_v1  ;;  %v5415_v20 = vld [vmem:[%s6784_s3 + $0x50] sm:$0xff]  }
  0xad   : > { %4837 = vmatprep.subr.bf16.mxu1 %v5578_v1 }
  0xae   : > { %4794 = vmatmul.mubr.bf16.vlgmr.msra.gmra.mrb[16].mxu0 %v5737_v18 }
  0xaf   : > { %4814 = vmatmul.mubr.bf16.vlgmr.msra.gmra.mrb[16].mxu1 %v5737_v18  ;;  %4818 = vmatpush3.bf16.msra.mxu0 %v5362_v21  ;;  %v5416_v21 = vld [vmem:[%s6784_s3 + $0x18] sm:$0xff]  }
  0xb0   : > { %4838 = vmatpush3.bf16.msra.mxu1 %v5363_v22  ;;  %4819 = vmatprep.subr.bf16.mxu0 %v5578_v1  ;;  %v5417_v22 = vld [vmem:[%s6784_s3 + $0x58] sm:$0xff]  }
  0xb1   : > { %4839 = vmatprep.subr.bf16.mxu1 %v5578_v1  ;;  %4833 = vmatprep.mubr.msk.bf16.mxu0 %vm5579_vm0, %v5578_v1 }
  0xb2   : > { %4853 = vmatprep.mubr.msk.bf16.mxu1 %vm5579_vm0, %v5578_v1 }
  0xb3   : > { %4820 = vmatpush3.bf16.msra.mxu0 %v5364_v23  ;;  %v5418_v23 = vld [vmem:[%s6784_s3 + $0x20] sm:$0xff]  }
  0xb4   : > { %4840 = vmatpush3.bf16.msra.mxu1 %v5365_v24  ;;  %4821 = vmatprep.subr.bf16.mxu0 %v5578_v1  ;;  %v5419_v24 = vld [vmem:[%s6784_s3 + $0x60] sm:$0xff]  }
  0xb5   : > { %4841 = vmatprep.subr.bf16.mxu1 %v5578_v1 }
  0xb7   : > { %4822 = vmatpush3.bf16.msra.mxu0 %v5366_v25  ;;  %v5420_v25 = vld [vmem:[%s6784_s3 + $0x28] sm:$0xff]  }
  0xb8   : > { %4842 = vmatpush3.bf16.msra.mxu1 %v5367_v26  ;;  %4823 = vmatprep.subr.bf16.mxu0 %v5578_v1  ;;  %v5421_v26 = vld [vmem:[%s6784_s3 + $0x68] sm:$0xff]  }
  0xb9   : > { %4843 = vmatprep.subr.bf16.mxu1 %v5578_v1 }
  0xbb   : > { %4824 = vmatpush3.bf16.msra.mxu0 %v5368_v27 }
  0xbc   : > { %4844 = vmatpush3.bf16.msra.mxu1 %v5369_v28  ;;  %4825 = vmatprep.subr.bf16.mxu0 %v5578_v1 }
  0xbd   : > { %4845 = vmatprep.subr.bf16.mxu1 %v5578_v1 }
  0xbf   : > { %4826 = vmatpush3.bf16.msra.mxu0 %v5370_v29 }
  0xc0   : > { %4846 = vmatpush3.bf16.msra.mxu1 %v5371_v30  ;;  %4827 = vmatprep.subr.bf16.mxu0 %v5578_v1 }
  0xc1   : > { %4847 = vmatprep.subr.bf16.mxu1 %v5578_v1 }
  0xc3   : > { %4828 = vmatpush3.bf16.msra.mxu0 %v5372_v31 }
  0xc4   : > { %4848 = vmatpush3.bf16.msra.mxu1 %v5373_v32  ;;  %4829 = vmatprep.subr.bf16.mxu0 %v5578_v1  ;;  %v5422_v32 = vld [vmem:[%s6784_s3 + $0x30] sm:$0xff]  }
  0xc5   : > { %4849 = vmatprep.subr.bf16.mxu1 %v5578_v1 }
  0xc7   : > { %4830 = vmatpush3.bf16.msra.mxu0 %v5374_v33 }
  0xc8   : > { %4850 = vmatpush3.bf16.msra.mxu1 %v5375_v34  ;;  %4831 = vmatprep.subr.bf16.mxu0 %v5578_v1 }
  0xc9   : > { %4851 = vmatprep.subr.bf16.mxu1 %v5578_v1 }
  0xcb   : > { %4832 = vmatpush3.bf16.msra.mxu0 %v5376_v35  ;;  %v5423_v35 = vld [vmem:[%s6784_s3 + $0x70] sm:$0xff]  }
  0xcc   : > { %4852 = vmatpush3.bf16.msra.mxu1 %v5377_v36  ;;  %4857 = vmatprep.subr.bf16.mxu0 %v5578_v1 }
  0xcd   : > { %4877 = vmatprep.subr.bf16.mxu1 %v5578_v1 }
  0xce   : > { %4834 = vmatmul.mubr.bf16.vlgmr.msra.gmra.mrb[20].mxu0 %v5737_v18 }
  0xcf   : > { %4854 = vmatmul.mubr.bf16.vlgmr.msra.gmra.mrb[20].mxu1 %v5737_v18  ;;  %4858 = vmatpush3.bf16.msra.mxu0 %v5378_v37  ;;  %v5424_v37 = vld [vmem:[%s6784_s3 + $0x38] sm:$0xff]  }
  0xd0   : > { %4878 = vmatpush3.bf16.msra.mxu1 %v5379_v38  ;;  %4859 = vmatprep.subr.bf16.mxu0 %v5578_v1  ;;  %v5425_v38 = vld [vmem:[%s6784_s3 + $0x78] sm:$0xff]  }
  0xd1   : > { %4879 = vmatprep.subr.bf16.mxu1 %v5578_v1  ;;  %4873 = vmatprep.mubr.msk.bf16.mxu0 %vm5579_vm0, %v5578_v1 }
  0xd2   : > { %4893 = vmatprep.mubr.msk.bf16.mxu1 %vm5579_vm0, %v5578_v1 }
  0xd3   : > { %4860 = vmatpush3.bf16.msra.mxu0 %v5380_v39  ;;  %v5426_v39 = vld [vmem:[%s6784_s3 + $0x80] sm:$0xff]  }
  0xd4   : > { %4880 = vmatpush3.bf16.msra.mxu1 %v5381_v40  ;;  %4861 = vmatprep.subr.bf16.mxu0 %v5578_v1  ;;  %v5427_v40 = vld [vmem:[%s6784_s3 + $0xc0] sm:$0xff]  }
  0xd5   : > { %4881 = vmatprep.subr.bf16.mxu1 %v5578_v1 }
  0xd7   : > { %4862 = vmatpush3.bf16.msra.mxu0 %v5382_v41  ;;  %v5428_v41 = vld [vmem:[%s6784_s3 + $0x88] sm:$0xff]  }
  0xd8   : > { %4882 = vmatpush3.bf16.msra.mxu1 %v5383_v42  ;;  %4863 = vmatprep.subr.bf16.mxu0 %v5578_v1  ;;  %v5429_v42 = vld [vmem:[%s6784_s3 + $0xc8] sm:$0xff]  }
  0xd9   : > { %4883 = vmatprep.subr.bf16.mxu1 %v5578_v1 }
  0xdb   : > { %4864 = vmatpush3.bf16.msra.mxu0 %v5384_v43  ;;  %v5430_v43 = vld [vmem:[%s6784_s3 + $0x90] sm:$0xff]  }
  0xdc   : > { %4884 = vmatpush3.bf16.msra.mxu1 %v5385_v44  ;;  %4865 = vmatprep.subr.bf16.mxu0 %v5578_v1  ;;  %v5431_v44 = vld [vmem:[%s6784_s3 + $0xd0] sm:$0xff]  }
  0xdd   : > { %4885 = vmatprep.subr.bf16.mxu1 %v5578_v1 }
  0xdf   : > { %4866 = vmatpush3.bf16.msra.mxu0 %v5386_v45  ;;  %v5432_v45 = vld [vmem:[%s6784_s3 + $0x98] sm:$0xff]  }
  0xe0   : > { %4886 = vmatpush3.bf16.msra.mxu1 %v5387_v46  ;;  %4867 = vmatprep.subr.bf16.mxu0 %v5578_v1  ;;  %v5433_v46 = vld [vmem:[%s6784_s3 + $0xd8] sm:$0xff]  }
  0xe1   : > { %4887 = vmatprep.subr.bf16.mxu1 %v5578_v1 }
  0xe3   : > { %4868 = vmatpush3.bf16.msra.mxu0 %v5388_v47  ;;  %v5434_v47 = vld [vmem:[%s6784_s3 + $0xa0] sm:$0xff]  }
  0xe4   : > { %4888 = vmatpush3.bf16.msra.mxu1 %v5389_v48  ;;  %4869 = vmatprep.subr.bf16.mxu0 %v5578_v1  ;;  %v5435_v48 = vld [vmem:[%s6784_s3 + $0xe0] sm:$0xff]  }
  0xe5   : > { %4889 = vmatprep.subr.bf16.mxu1 %v5578_v1 }
  0xe7   : > { %4870 = vmatpush3.bf16.msra.mxu0 %v5390_v49  ;;  %v5436_v49 = vld [vmem:[%s6784_s3 + $0xa8] sm:$0xff]  }
  0xe8   : > { %4890 = vmatpush3.bf16.msra.mxu1 %v5391_v50  ;;  %4871 = vmatprep.subr.bf16.mxu0 %v5578_v1  ;;  %v5437_v50 = vld [vmem:[%s6784_s3 + $0xe8] sm:$0xff]  }
  0xe9   : > { %4891 = vmatprep.subr.bf16.mxu1 %v5578_v1 }
  0xeb   : > { %4872 = vmatpush3.bf16.msra.mxu0 %v5392_v51 }
  0xec   : > { %4892 = vmatpush3.bf16.msra.mxu1 %v5393_v52  ;;  %4897 = vmatprep.subr.bf16.mxu0 %v5578_v1 }
  0xed   : > { %4917 = vmatprep.subr.bf16.mxu1 %v5578_v1 }
  0xee   : > { %4874 = vmatmul.mubr.bf16.vlgmr.msra.gmra.mrb[24].mxu0 %v5737_v18 }
  0xef   : > { %4894 = vmatmul.mubr.bf16.vlgmr.msra.gmra.mrb[24].mxu1 %v5737_v18  ;;  %4898 = vmatpush3.bf16.msra.mxu0 %v5394_v53 }
  0xf0   : > { %4918 = vmatpush3.bf16.msra.mxu1 %v5395_v54  ;;  %4899 = vmatprep.subr.bf16.mxu0 %v5578_v1 }
  0xf1   : > { %4919 = vmatprep.subr.bf16.mxu1 %v5578_v1  ;;  %4913 = vmatprep.mubr.msk.bf16.mxu0 %vm5579_vm0, %v5578_v1 }
  0xf2   : > { %4933 = vmatprep.mubr.msk.bf16.mxu1 %vm5579_vm0, %v5578_v1 }
  0xf3   : > { %4900 = vmatpush3.bf16.msra.mxu0 %v5396_v55 }
  0xf4   : > { %4920 = vmatpush3.bf16.msra.mxu1 %v5397_v56  ;;  %4901 = vmatprep.subr.bf16.mxu0 %v5578_v1  ;;  %v5438_v56 = vld [vmem:[%s6784_s3 + $0xb0] sm:$0xff]  }
  0xf5   : > { %4921 = vmatprep.subr.bf16.mxu1 %v5578_v1 }
  0xf7   : > { %4902 = vmatpush3.bf16.msra.mxu0 %v5398_v57 }
  0xf8   : > { %4922 = vmatpush3.bf16.msra.mxu1 %v5399_v58  ;;  %4903 = vmatprep.subr.bf16.mxu0 %v5578_v1 }
  0xf9   : > { %4923 = vmatprep.subr.bf16.mxu1 %v5578_v1 }
  0xfb   : > { %4904 = vmatpush3.bf16.msra.mxu0 %v5400_v59  ;;  %v5439_v59 = vld [vmem:[%s6784_s3 + $0xf0] sm:$0xff]  }
  0xfc   : > { %4924 = vmatpush3.bf16.msra.mxu1 %v5401_v60  ;;  %4905 = vmatprep.subr.bf16.mxu0 %v5578_v1 }
  0xfd   : > { %4925 = vmatprep.subr.bf16.mxu1 %v5578_v1 }
  0xff   : > { %4906 = vmatpush3.bf16.msra.mxu0 %v5402_v61  ;;  %v5440_v61 = vld [vmem:[%s6784_s3 + $0xb8] sm:$0xff]  }
 0x100   : > { %4926 = vmatpush3.bf16.msra.mxu1 %v5403_v62  ;;  %4907 = vmatprep.subr.bf16.mxu0 %v5578_v1  ;;  %v5441_v62 = vld [vmem:[%s6784_s3 + $0xf8] sm:$0xff]  }
 0x101   : > { %v6212_v2 = vpop.f32.mrb[0].mxu0  ;;  %4927 = vmatprep.subr.bf16.mxu1 %v5578_v1 }
 0x102   : > { %v6215_v3 = vpop.f32.mrb[0].mxu1  ;;  %v4635_v4 = vpop.f32.mrb[1].mxu0 }
 0x103   : > { %v4655_v5 = vpop.f32.mrb[1].mxu1  ;;  %v463_v6 = vpop.f32.mrb[2].mxu0  ;;  %4908 = vmatpush3.bf16.msra.mxu0 %v5404_v63  ;;  %v5442_v63 = vld [vmem:[%s6784_s3 + $0x100] sm:$0xff]   ;;  %v5444_v4 = vld [vmem:[%s6784_s3 + $0x108] sm:$0xff]  }
 0x104   : > { %v551_v8 = vpop.f32.mrb[2].mxu1  ;;  %4928 = vmatpush3.bf16.msra.mxu1 %v5405_v0  ;;  %v4636_v9 = vpop.f32.mrb[3].mxu0  ;;  %4909 = vmatprep.subr.bf16.mxu0 %v5578_v1  ;;  %v5443_v0 = vld [vmem:[%s6784_s3 + $0x140] sm:$0xff]   ;;  %v5445_v5 = vld [vmem:[%s6784_s3 + $0x148] sm:$0xff]   ;;  %v5446_v6 = vld [vmem:[%s6784_s3 + $0x110] sm:$0xff]  }
 0x105   : > { %v4656_v11 = vpop.f32.mrb[3].mxu1  ;;  %4929 = vmatprep.subr.bf16.mxu1 %v5578_v1  ;;  %v5448_v8 = vld [vmem:[%s6784_s3 + $0x118] sm:$0xff]  }
 0x106   : > { %v5449_v9 = vld [vmem:[%s6784_s3 + $0x158] sm:$0xff]   ;;  %v5451_v11 = vld [vmem:[%s6784_s3 + $0x160] sm:$0xff]  }
 0x107   : > { %4910 = vmatpush3.bf16.msra.mxu0 %v5406_v7  ;;  %v5447_v7 = vld [vmem:[%s6784_s3 + $0x150] sm:$0xff]  }
 0x108   : > { %4930 = vmatpush3.bf16.msra.mxu1 %v5407_v10  ;;  %4911 = vmatprep.subr.bf16.mxu0 %v5578_v1  ;;  %v5450_v10 = vld [vmem:[%s6784_s3 + $0x120] sm:$0xff]  }
 0x109   : > { %4931 = vmatprep.subr.bf16.mxu1 %v5578_v1 }
 0x10b   : > { %4912 = vmatpush3.bf16.msra.mxu0 %v5408_v12  ;;  %v5452_v12 = vld [vmem:[%s6784_s3 + $0x128] sm:$0xff]  }
 0x10c   : > { %4932 = vmatpush3.bf16.msra.mxu1 %v5409_v13  ;;  %4937 = vmatprep.subr.bf16.mxu0 %v5578_v1  ;;  %v5453_v13 = vld [vmem:[%s6784_s3 + $0x168] sm:$0xff]  }
 0x10d   : > { %4957 = vmatprep.subr.bf16.mxu1 %v5578_v1 }
 0x10e   : > { %4914 = vmatmul.mubr.bf16.vlgmr.msra.gmra.mrb[28].mxu0 %v5737_v18 }
 0x10f   : > { %4934 = vmatmul.mubr.bf16.vlgmr.msra.gmra.mrb[28].mxu1 %v5737_v18  ;;  %4938 = vmatpush3.bf16.msra.mxu0 %v5410_v14 }
 0x110   : > { %4958 = vmatpush3.bf16.msra.mxu1 %v5411_v15  ;;  %4939 = vmatprep.subr.bf16.mxu0 %v5578_v1 }
 0x111   : > { %4959 = vmatprep.subr.bf16.mxu1 %v5578_v1  ;;  %4953 = vmatprep.mubr.msk.bf16.mxu0 %vm5579_vm0, %v5578_v1 }
 0x112   : > { %4973 = vmatprep.mubr.msk.bf16.mxu1 %vm5579_vm0, %v5578_v1 }
 0x113   : > { %4940 = vmatpush3.bf16.msra.mxu0 %v5412_v16 }
 0x114   : > { %4960 = vmatpush3.bf16.msra.mxu1 %v5413_v17  ;;  %4941 = vmatprep.subr.bf16.mxu0 %v5578_v1 }
 0x115   : > { %4961 = vmatprep.subr.bf16.mxu1 %v5578_v1 }
 0x117   : > { %4942 = vmatpush3.bf16.msra.mxu0 %v5414_v19 }
 0x118   : > { %4962 = vmatpush3.bf16.msra.mxu1 %v5415_v20  ;;  %4943 = vmatprep.subr.bf16.mxu0 %v5578_v1  ;;  %v5454_v20 = vld [vmem:[%s6784_s3 + $0x130] sm:$0xff]  }
 0x119   : > { %4963 = vmatprep.subr.bf16.mxu1 %v5578_v1 }
 0x11b   : > { %4944 = vmatpush3.bf16.msra.mxu0 %v5416_v21 }
 0x11c   : > { %4964 = vmatpush3.bf16.msra.mxu1 %v5417_v22  ;;  %4945 = vmatprep.subr.bf16.mxu0 %v5578_v1 }
 0x11d   : > { %4965 = vmatprep.subr.bf16.mxu1 %v5578_v1 }
 0x11f   : > { %4946 = vmatpush3.bf16.msra.mxu0 %v5418_v23  ;;  %v5455_v23 = vld [vmem:[%s6784_s3 + $0x170] sm:$0xff]  }
 0x120   : > { %4966 = vmatpush3.bf16.msra.mxu1 %v5419_v24  ;;  %4947 = vmatprep.subr.bf16.mxu0 %v5578_v1 }
 0x121   : > { %v6286_v27 = vpop.f32.mrb[4].mxu0  ;;  %4967 = vmatprep.subr.bf16.mxu1 %v5578_v1 }
 0x122   : > { %v6289_v28 = vpop.f32.mrb[4].mxu1  ;;  %v4675_v29 = vpop.f32.mrb[5].mxu0 }
 0x123   : > { %v4695_v30 = vpop.f32.mrb[5].mxu1  ;;  %v639_v31 = vpop.f32.mrb[6].mxu0  ;;  %4948 = vmatpush3.bf16.msra.mxu0 %v5420_v25  ;;  %v5456_v25 = vld [vmem:[%s6784_s3 + $0x138] sm:$0xff]   ;;  %v5458_v29 = vld [vmem:[%s6784_s3 + $0x180] sm:$0xff]  }
 0x124   : > { %v727_v33 = vpop.f32.mrb[6].mxu1  ;;  %4968 = vmatpush3.bf16.msra.mxu1 %v5421_v26  ;;  %v4676_v34 = vpop.f32.mrb[7].mxu0  ;;  %4949 = vmatprep.subr.bf16.mxu0 %v5578_v1  ;;  %v5457_v26 = vld [vmem:[%s6784_s3 + $0x178] sm:$0xff]   ;;  %v5459_v30 = vld [vmem:[%s6784_s3 + $0x1c0] sm:$0xff]   ;;  %v5460_v31 = vld [vmem:[%s6784_s3 + $0x188] sm:$0xff]  }
 0x125   : > { %v4696_v36 = vpop.f32.mrb[7].mxu1  ;;  %4969 = vmatprep.subr.bf16.mxu1 %v5578_v1  ;;  %v5462_v33 = vld [vmem:[%s6784_s3 + $0x190] sm:$0xff]  }
 0x126   : > { %v5463_v34 = vld [vmem:[%s6784_s3 + $0x1d0] sm:$0xff]   ;;  %v5465_v36 = vld [vmem:[%s6784_s3 + $0x1d8] sm:$0xff]  }
 0x127   : > { %4950 = vmatpush3.bf16.msra.mxu0 %v5422_v32  ;;  %v5461_v32 = vld [vmem:[%s6784_s3 + $0x1c8] sm:$0xff]  }
 0x128   : > { %4970 = vmatpush3.bf16.msra.mxu1 %v5423_v35  ;;  %4951 = vmatprep.subr.bf16.mxu0 %v5578_v1  ;;  %v5464_v35 = vld [vmem:[%s6784_s3 + $0x198] sm:$0xff]  }
 0x129   : > { %4971 = vmatprep.subr.bf16.mxu1 %v5578_v1 }
 0x12b   : > { %4952 = vmatpush3.bf16.msra.mxu0 %v5424_v37  ;;  %v5466_v37 = vld [vmem:[%s6784_s3 + $0x1a0] sm:$0xff]  }
 0x12c   : > { %4972 = vmatpush3.bf16.msra.mxu1 %v5425_v38  ;;  %4977 = vmatprep.subr.bf16.mxu0 %v5578_v1  ;;  %v5467_v38 = vld [vmem:[%s6784_s3 + $0x1e0] sm:$0xff]  }
 0x12d   : > { %4997 = vmatprep.subr.bf16.mxu1 %v5578_v1 }
 0x12e   : > { %4954 = vmatmul.mubr.bf16.vlgmr.msra.gmra.mrb[32].mxu0 %v5737_v18 }
 0x12f   : > { %4974 = vmatmul.mubr.bf16.vlgmr.msra.gmra.mrb[32].mxu1 %v5737_v18  ;;  %4978 = vmatpush3.bf16.msra.mxu0 %v5426_v39  ;;  %v5468_v39 = vld [vmem:[%s6784_s3 + $0x1a8] sm:$0xff]  }
 0x130   : > { %4998 = vmatpush3.bf16.msra.mxu1 %v5427_v40  ;;  %4979 = vmatprep.subr.bf16.mxu0 %v5578_v1  ;;  %v5469_v40 = vld [vmem:[%s6784_s3 + $0x1e8] sm:$0xff]  }
 0x131   : > { %4999 = vmatprep.subr.bf16.mxu1 %v5578_v1  ;;  %4993 = vmatprep.mubr.msk.bf16.mxu0 %vm5579_vm0, %v5578_v1 }
 0x132   : > { %5013 = vmatprep.mubr.msk.bf16.mxu1 %vm5579_vm0, %v5578_v1 }
 0x133   : > { %4980 = vmatpush3.bf16.msra.mxu0 %v5428_v41 }
 0x134   : > { %5000 = vmatpush3.bf16.msra.mxu1 %v5429_v42  ;;  %4981 = vmatprep.subr.bf16.mxu0 %v5578_v1 }
 0x135   : > { %5001 = vmatprep.subr.bf16.mxu1 %v5578_v1 }
 0x137   : > { %4982 = vmatpush3.bf16.msra.mxu0 %v5430_v43 }
 0x138   : > { %5002 = vmatpush3.bf16.msra.mxu1 %v5431_v44  ;;  %4983 = vmatprep.subr.bf16.mxu0 %v5578_v1 }
 0x139   : > { %5003 = vmatprep.subr.bf16.mxu1 %v5578_v1 }
 0x13b   : > { %4984 = vmatpush3.bf16.msra.mxu0 %v5432_v45 }
 0x13c   : > { %5004 = vmatpush3.bf16.msra.mxu1 %v5433_v46  ;;  %4985 = vmatprep.subr.bf16.mxu0 %v5578_v1  ;;  %v5470_v46 = vld [vmem:[%s6784_s3 + $0x1b0] sm:$0xff]  }
 0x13d   : > { %5005 = vmatprep.subr.bf16.mxu1 %v5578_v1 }
 0x13f   : > { %4986 = vmatpush3.bf16.msra.mxu0 %v5434_v47 }
 0x140   : > { %5006 = vmatpush3.bf16.msra.mxu1 %v5435_v48  ;;  %4987 = vmatprep.subr.bf16.mxu0 %v5578_v1 }
 0x141   : > { %v6360_v51 = vpop.f32.mrb[8].mxu0  ;;  %5007 = vmatprep.subr.bf16.mxu1 %v5578_v1 }
 0x142   : > { %v6363_v52 = vpop.f32.mrb[8].mxu1  ;;  %v4715_v53 = vpop.f32.mrb[9].mxu0 }
 0x143   : > { %v4735_v54 = vpop.f32.mrb[9].mxu1  ;;  %v815_v55 = vpop.f32.mrb[10].mxu0  ;;  %4988 = vmatpush3.bf16.msra.mxu0 %v5436_v49  ;;  %v5471_v49 = vld [vmem:[%s6784_s3 + $0x1f0] sm:$0xff]   ;;  %v5472_v53 = vld [vmem:[%s6784_s3 + $0x1b8] sm:$0xff]  }
 0x144   : > { %v903_v57 = vpop.f32.mrb[10].mxu1  ;;  %5008 = vmatpush3.bf16.msra.mxu1 %v5437_v50  ;;  %v4716_v58 = vpop.f32.mrb[11].mxu0  ;;  %4989 = vmatprep.subr.bf16.mxu0 %v5578_v1  ;;  %v5473_v54 = vld [vmem:[%s6784_s3 + $0x1f8] sm:$0xff]  }
 0x145   : > { %v4736_v60 = vpop.f32.mrb[11].mxu1  ;;  %5009 = vmatprep.subr.bf16.mxu1 %v5578_v1 }
 0x147   : > { %4990 = vmatpush3.bf16.msra.mxu0 %v5438_v56 }
 0x148   : > { %5010 = vmatpush3.bf16.msra.mxu1 %v5439_v59  ;;  %4991 = vmatprep.subr.bf16.mxu0 %v5578_v1  ;;  %v1082_v59 = vmul.f32 0.25, %v6212_v2 }
 0x149   : > { %5011 = vmatprep.subr.bf16.mxu1 %v5578_v1 }
 0x14a   : > { %v2754_v60 = vpack.c.bf16 %v1082_v59, %v1082_v59 }
 0x14b   : > { %4992 = vmatpush3.bf16.msra.mxu0 %v5440_v61 }
 0x14c   : > { %5012 = vmatpush3.bf16.msra.mxu1 %v5441_v62  ;;  %5017 = vmatprep.subr.bf16.mxu0 %v5578_v1 }
 0x14d   : > { %5037 = vmatprep.subr.bf16.mxu1 %v5578_v1 }
 0x14e   : > { %4994 = vmatmul.mubr.bf16.vlgmr.msra.gmra.mrb[36].mxu0 %v5737_v18 }
 0x14f   : > { %5014 = vmatmul.mubr.bf16.vlgmr.msra.gmra.mrb[36].mxu1 %v5737_v18  ;;  %5018 = vmatpush3.bf16.msra.mxu0 %v5442_v63 }
 0x150   : > { %5038 = vmatpush3.bf16.msra.mxu1 %v5443_v0  ;;  %5019 = vmatprep.subr.bf16.mxu0 %v5578_v1 }
 0x151   : > { %5039 = vmatprep.subr.bf16.mxu1 %v5578_v1  ;;  %5033 = vmatprep.mubr.msk.bf16.mxu0 %vm5579_vm0, %v5578_v1 }
 0x152   : > { %5053 = vmatprep.mubr.msk.bf16.mxu1 %vm5579_vm0, %v5578_v1 }
 0x153   : > { %5020 = vmatpush3.bf16.msra.mxu0 %v5444_v4 }
 0x154   : > { %5040 = vmatpush3.bf16.msra.mxu1 %v5445_v5  ;;  %5021 = vmatprep.subr.bf16.mxu0 %v5578_v1 }
 0x155   : > { %5041 = vmatprep.subr.bf16.mxu1 %v5578_v1 }
 0x157   : > { %5022 = vmatpush3.bf16.msra.mxu0 %v5446_v6 }
 0x158   : > { %5042 = vmatpush3.bf16.msra.mxu1 %v5447_v7  ;;  %5023 = vmatprep.subr.bf16.mxu0 %v5578_v1 }
 0x159   : > { %5043 = vmatprep.subr.bf16.mxu1 %v5578_v1 }
 0x15b   : > { %5024 = vmatpush3.bf16.msra.mxu0 %v5448_v8 }
 0x15c   : > { %5044 = vmatpush3.bf16.msra.mxu1 %v5449_v9  ;;  %5025 = vmatprep.subr.bf16.mxu0 %v5578_v1 }
 0x15d   : > { %5045 = vmatprep.subr.bf16.mxu1 %v5578_v1 }
 0x15f   : > { %5026 = vmatpush3.bf16.msra.mxu0 %v5450_v10 }
 0x160   : > { %5046 = vmatpush3.bf16.msra.mxu1 %v5451_v11  ;;  %5027 = vmatprep.subr.bf16.mxu0 %v5578_v1  ;;  %v1084_v11 = vmul.f32 0.25, %v6286_v27 }
 0x161   : > { %v6434_v14 = vpop.f32.mrb[12].mxu0  ;;  %5047 = vmatprep.subr.bf16.mxu1 %v5578_v1 }
 0x162   : > { %v6437_v15 = vpop.f32.mrb[12].mxu1  ;;  %v4755_v16 = vpop.f32.mrb[13].mxu0 }
 0x163   : > { %v4775_v17 = vpop.f32.mrb[13].mxu1  ;;  %v991_v19 = vpop.f32.mrb[14].mxu0  ;;  %5028 = vmatpush3.bf16.msra.mxu0 %v5452_v12  ;;  %v1085_v12 = vmul.f32 0.25, %v6289_v28 }
 0x164   : > { %v1079_v21 = vpop.f32.mrb[14].mxu1  ;;  %5048 = vmatpush3.bf16.msra.mxu1 %v5453_v13  ;;  %v4756_v22 = vpop.f32.mrb[15].mxu0  ;;  %5029 = vmatprep.subr.bf16.mxu0 %v5578_v1  ;;  %v2756_v13 = vpack.c.bf16 %v1084_v11, %v1084_v11 }
 0x165   : > { %v4776_v24 = vpop.f32.mrb[15].mxu1  ;;  %5049 = vmatprep.subr.bf16.mxu1 %v5578_v1  ;;  %v2757_v16 = vpack.c.bf16 %v1085_v12, %v1085_v12 }
 0x167   : > { %5030 = vmatpush3.bf16.msra.mxu0 %v5454_v20 }
 0x168   : > { %5050 = vmatpush3.bf16.msra.mxu1 %v5455_v23  ;;  %5031 = vmatprep.subr.bf16.mxu0 %v5578_v1 }
 0x169   : > { %5051 = vmatprep.subr.bf16.mxu1 %v5578_v1 }
 0x16b   : > { %5032 = vmatpush3.bf16.msra.mxu0 %v5456_v25 }
 0x16c   : > { %5052 = vmatpush3.bf16.msra.mxu1 %v5457_v26  ;;  %5057 = vmatprep.subr.bf16.mxu0 %v5578_v1 }
 0x16d   : > { %5077 = vmatprep.subr.bf16.mxu1 %v5578_v1 }
 0x16e   : > { %5034 = vmatmul.mubr.bf16.vlgmr.msra.gmra.mrb[40].mxu0 %v5737_v18 }
 0x16f   : > { %5054 = vmatmul.mubr.bf16.vlgmr.msra.gmra.mrb[40].mxu1 %v5737_v18  ;;  %5058 = vmatpush3.bf16.msra.mxu0 %v5458_v29 }
 0x170   : > { %5078 = vmatpush3.bf16.msra.mxu1 %v5459_v30  ;;  %5059 = vmatprep.subr.bf16.mxu0 %v5578_v1  ;;  %v1086_v30 = vmul.f32 0.25, %v6360_v51 }
 0x171   : > { %5079 = vmatprep.subr.bf16.mxu1 %v5578_v1  ;;  %5073 = vmatprep.mubr.msk.bf16.mxu0 %vm5579_vm0, %v5578_v1 }
 0x172   : > { %5093 = vmatprep.mubr.msk.bf16.mxu1 %vm5579_vm0, %v5578_v1 }
 0x173   : > { %5060 = vmatpush3.bf16.msra.mxu0 %v5460_v31  ;;  %v1087_v31 = vmul.f32 0.25, %v6363_v52 }
 0x174   : > { %5080 = vmatpush3.bf16.msra.mxu1 %v5461_v32  ;;  %5061 = vmatprep.subr.bf16.mxu0 %v5578_v1  ;;  %v2758_v32 = vpack.c.bf16 %v1086_v30, %v1086_v30 }
 0x175   : > { %5081 = vmatprep.subr.bf16.mxu1 %v5578_v1 }
 0x177   : > { %5062 = vmatpush3.bf16.msra.mxu0 %v5462_v33  ;;  %v2759_v33 = vpack.c.bf16 %v1087_v31, %v1087_v31 }
 0x178   : > { %5082 = vmatpush3.bf16.msra.mxu1 %v5463_v34  ;;  %5063 = vmatprep.subr.bf16.mxu0 %v5578_v1 }
 0x179   : > { %5083 = vmatprep.subr.bf16.mxu1 %v5578_v1 }
 0x17b   : > { %5064 = vmatpush3.bf16.msra.mxu0 %v5464_v35 }
 0x17c   : > { %5084 = vmatpush3.bf16.msra.mxu1 %v5465_v36  ;;  %5065 = vmatprep.subr.bf16.mxu0 %v5578_v1 }
 0x17d   : > { %5085 = vmatprep.subr.bf16.mxu1 %v5578_v1 }
 0x17f   : > { %5066 = vmatpush3.bf16.msra.mxu0 %v5466_v37 }
 0x180   : > { %5086 = vmatpush3.bf16.msra.mxu1 %v5467_v38  ;;  %5067 = vmatprep.subr.bf16.mxu0 %v5578_v1 }
 0x181   : > { %v1300_v41 = vpop.f32.mrb[16].mxu0  ;;  %5087 = vmatprep.subr.bf16.mxu1 %v5578_v1 }
 0x182   : > { %v1388_v42 = vpop.f32.mrb[16].mxu1  ;;  %v4795_v43 = vpop.f32.mrb[17].mxu0  ;;  %v2762_v55 = vpack.c.bf16 %v1300_v41, %v1300_v41 }
 0x183   : > { %v4815_v44 = vpop.f32.mrb[17].mxu1  ;;  %v1303_v45 = vpop.f32.mrb[18].mxu0  ;;  %5068 = vmatpush3.bf16.msra.mxu0 %v5468_v39  ;;  %v2763_v56 = vpack.c.bf16 %v1388_v42, %v1388_v42 }
 0x184   : > { %v1391_v47 = vpop.f32.mrb[18].mxu1  ;;  %5088 = vmatpush3.bf16.msra.mxu1 %v5469_v40  ;;  %v4796_v48 = vpop.f32.mrb[19].mxu0  ;;  %5069 = vmatprep.subr.bf16.mxu0 %v5578_v1  ;;  %v2775_v57 = vsel %vm2770_vm1, %v2762_v55, 0  ;;  %v1088_v44 = vmul.f32 0.25, %v6434_v14  ;;  %v1089_v45 = vmul.f32 0.25, %v6437_v15 }
 0x185   : > { %v4816_v50 = vpop.f32.mrb[19].mxu1  ;;  %5089 = vmatprep.subr.bf16.mxu1 %v5578_v1  ;;  %v2821_v58 = vsel %vm2770_vm1, %v2763_v56, 0 }
 0x186   : > { %v2761_v47 = vpack.c.bf16 %v1089_v45, %v1089_v45 }
 0x187   : > { %5070 = vmatpush3.bf16.msra.mxu0 %v5470_v46  ;;  %v2760_v46 = vpack.c.bf16 %v1088_v44, %v1088_v44 }
 0x188   : > { %5090 = vmatpush3.bf16.msra.mxu1 %v5471_v49  ;;  %5071 = vmatprep.subr.bf16.mxu0 %v5578_v1 }
 0x189   : > { %5091 = vmatprep.subr.bf16.mxu1 %v5578_v1 }
 0x18b   : > { %5072 = vmatpush3.bf16.msra.mxu0 %v5472_v53 }
 0x18c   : > { %5092 = vmatpush3.bf16.msra.mxu1 %v5473_v54  ;;  %5097 = vmatprep.subr.bf16.mxu0 %v5578_v1 }
 0x18d   : > { %5103 = vmatprep.subr.bf16.mxu1 %v5578_v1 }
 0x18e   : > { %5074 = vmatmul.mubr.bf16.vlgmr.msra.gmra.mrb[44].mxu0 %v5737_v18 }
 0x18f   : > { %5094 = vmatmul.mubr.bf16.vlgmr.msra.gmra.mrb[44].mxu1 %v5737_v18  ;;  %5099 = vmatprep.mubr.msk.bf16.mxu0 %vm5579_vm0, %v5578_v1  ;;  %v1083_v18 = vmul.f32 0.25, %v6215_v3 }
 0x190   : > { %5105 = vmatprep.mubr.msk.bf16.mxu1 %vm5579_vm0, %v5578_v1 }
 0x191   : > { %v2755_v61 = vpack.c.bf16 %v1083_v18, %v1083_v18 }
 0x194   : > { %5098 = vmatpush3.bf16.xpose.msra.mxu0 %v2775_v57 }
 0x195   : > { %5104 = vmatpush3.bf16.xpose.msra.mxu1 %v2821_v58  ;;  %5109 = vmatprep.subr.bf16.mxu0 %v5578_v1 }
 0x196   : > { %5115 = vmatprep.subr.bf16.mxu1 %v5578_v1 }
 0x19b   : > { %5100 = vmatmul.mubr.msk.bf16.vlgmr.msra.gmra.mrb[48].mxu0 %vm2770_vm1, %v2754_v60 }
 0x19c   : > { %5106 = vmatmul.mubr.msk.bf16.vlgmr.msra.gmra.mrb[48].mxu1 %vm2770_vm1, %v2755_v61  ;;  %5111 = vmatprep.mubr.msk.bf16.mxu0 %vm5579_vm0, %v5578_v1 }
 0x19d   : > { %5117 = vmatprep.mubr.msk.bf16.mxu1 %vm5579_vm0, %v5578_v1 }
 0x1a1   : > { %v1476_v2 = vpop.f32.mrb[20].mxu0 }
 0x1a2   : > { %v2764_v62 = vpack.c.bf16 %v1476_v2, %v1476_v2  ;;  %v1564_v63 = vpop.f32.mrb[20].mxu1  ;;  %v4835_v0 = vpop.f32.mrb[21].mxu0 }
 0x1a3   : > { %v2765_v4 = vpack.c.bf16 %v1564_v63, %v1564_v63  ;;  %v4855_v3 = vpop.f32.mrb[21].mxu1  ;;  %v1479_v5 = vpop.f32.mrb[22].mxu0 }
 0x1a4   : > { %v2867_v6 = vsel %vm2770_vm1, %v2764_v62, 0  ;;  %v1567_v7 = vpop.f32.mrb[22].mxu1  ;;  %v4836_v8 = vpop.f32.mrb[23].mxu0 }
 0x1a5   : > { %v2913_v9 = vsel %vm2770_vm1, %v2765_v4, 0  ;;  %v4856_v10 = vpop.f32.mrb[23].mxu1  ;;  %5110 = vmatpush3.bf16.xpose.msra.mxu0 %v2867_v6 }
 0x1a6   : > { %5116 = vmatpush3.bf16.xpose.msra.mxu1 %v2913_v9  ;;  %5121 = vmatprep.subr.bf16.mxu0 %v5578_v1 }
 0x1a7   : > { %5127 = vmatprep.subr.bf16.mxu1 %v5578_v1 }
 0x1ac   : > { %5112 = vmatmul.mubr.msk.bf16.vlgmr.msra.gmra.mrb[52].mxu0 %vm2770_vm1, %v2756_v13 }
 0x1ad   : > { %5118 = vmatmul.mubr.msk.bf16.vlgmr.msra.gmra.mrb[52].mxu1 %vm2770_vm1, %v2757_v16  ;;  %5123 = vmatprep.mubr.msk.bf16.mxu0 %vm5579_vm0, %v5578_v1 }
 0x1ae   : > { %5129 = vmatprep.mubr.msk.bf16.mxu1 %vm5579_vm0, %v5578_v1 }
 0x1c1   : > { %v1652_v27 = vpop.f32.mrb[24].mxu0 }
 0x1c2   : > { %v2766_v17 = vpack.c.bf16 %v1652_v27, %v1652_v27  ;;  %v1740_v19 = vpop.f32.mrb[24].mxu1  ;;  %v4875_v20 = vpop.f32.mrb[25].mxu0 }
 0x1c3   : > { %v2767_v21 = vpack.c.bf16 %v1740_v19, %v1740_v19  ;;  %v4895_v28 = vpop.f32.mrb[25].mxu1  ;;  %v1655_v22 = vpop.f32.mrb[26].mxu0 }
 0x1c4   : > { %v2959_v23 = vsel %vm2770_vm1, %v2766_v17, 0  ;;  %v1743_v24 = vpop.f32.mrb[26].mxu1  ;;  %v4876_v25 = vpop.f32.mrb[27].mxu0 }
 0x1c5   : > { %v3005_v26 = vsel %vm2770_vm1, %v2767_v21, 0  ;;  %v4896_v29 = vpop.f32.mrb[27].mxu1  ;;  %5122 = vmatpush3.bf16.xpose.msra.mxu0 %v2959_v23 }
 0x1c6   : > { %5128 = vmatpush3.bf16.xpose.msra.mxu1 %v3005_v26  ;;  %5133 = vmatprep.subr.bf16.mxu0 %v5578_v1 }
 0x1c7   : > { %5139 = vmatprep.subr.bf16.mxu1 %v5578_v1 }
 0x1cc   : > { %5124 = vmatmul.mubr.msk.bf16.vlgmr.msra.gmra.mrb[56].mxu0 %vm2770_vm1, %v2758_v32 }
 0x1cd   : > { %5130 = vmatmul.mubr.msk.bf16.vlgmr.msra.gmra.mrb[56].mxu1 %vm2770_vm1, %v2759_v33  ;;  %5135 = vmatprep.mubr.msk.bf16.mxu0 %vm5579_vm0, %v5578_v1 }
 0x1ce   : > { %5141 = vmatprep.mubr.msk.bf16.mxu1 %vm5579_vm0, %v5578_v1 }
 0x1e1   : > { %v1828_v51 = vpop.f32.mrb[28].mxu0 }
 0x1e2   : > { %v2768_v34 = vpack.c.bf16 %v1828_v51, %v1828_v51  ;;  %v1916_v35 = vpop.f32.mrb[28].mxu1  ;;  %v4915_v36 = vpop.f32.mrb[29].mxu0 }
 0x1e3   : > { %v2769_v37 = vpack.c.bf16 %v1916_v35, %v1916_v35  ;;  %v4935_v52 = vpop.f32.mrb[29].mxu1  ;;  %v1831_v38 = vpop.f32.mrb[30].mxu0 }
 0x1e4   : > { %v3051_v39 = vsel %vm2770_vm1, %v2768_v34, 0  ;;  %v1919_v40 = vpop.f32.mrb[30].mxu1  ;;  %v4916_v41 = vpop.f32.mrb[31].mxu0 }
 0x1e5   : > { %v3097_v42 = vsel %vm2770_vm1, %v2769_v37, 0  ;;  %v4936_v43 = vpop.f32.mrb[31].mxu1  ;;  %5134 = vmatpush3.bf16.xpose.msra.mxu0 %v3051_v39 }
 0x1e6   : > { %5140 = vmatpush3.bf16.xpose.msra.mxu1 %v3097_v42  ;;  %5145 = vmatprep.subr.bf16.mxu0 %v5578_v1 }
 0x1e7   : > { %5151 = vmatprep.subr.bf16.mxu1 %v5578_v1 }
 0x1ec   : > { %5136 = vmatmul.mubr.msk.bf16.vlgmr.msra.gmra.mrb[60].mxu0 %vm2770_vm1, %v2760_v46 }
 0x1ed   : > { %5142 = vmatmul.mubr.msk.bf16.vlgmr.msra.gmra.mrb[60].mxu1 %vm2770_vm1, %v2761_v47  ;;  %5147 = vmatprep.mubr.msk.bf16.mxu0 %vm5579_vm0, %v5578_v1 }
 0x1ee   : > { %5153 = vmatprep.mubr.msk.bf16.mxu1 %vm5579_vm0, %v5578_v1 }
 0x201   : > { %v2132_v14 = vpop.f32.mrb[32].mxu0 }
 0x202   : > { %v3220_v48 = vpack.c.bf16 %v2132_v14, %v2132_v14  ;;  %v4955_v49 = vpop.f32.mrb[33].mxu0  ;;  %v2220_v50 = vpop.f32.mrb[32].mxu1 }
 0x203   : > { %v2135_v15 = vpop.f32.mrb[34].mxu0  ;;  %v3221_v53 = vpack.c.bf16 %v2220_v50, %v2220_v50  ;;  %v4975_v54 = vpop.f32.mrb[33].mxu1 }
 0x204   : > { %v3233_v55 = vsel %vm3231_vm2, %v3220_v48, 0  ;;  %v4956_v56 = vpop.f32.mrb[35].mxu0  ;;  %v2223_v57 = vpop.f32.mrb[34].mxu1 }
 0x205   : > { %v3279_v58 = vsel %vm3231_vm2, %v3221_v53, 0  ;;  %v4976_v59 = vpop.f32.mrb[35].mxu1  ;;  %5146 = vmatpush3.bf16.msra.mxu0 %v3233_v55 }
 0x206   : > { %5152 = vmatpush3.bf16.msra.mxu1 %v3279_v58  ;;  %5157 = vmatprep.subr.bf16.mxu0 %v5578_v1 }
 0x207   : > { %5163 = vmatprep.subr.bf16.mxu1 %v5578_v1 }
 0x221   : > { %v6585_v18 = vpop.f32.mrb[36].mxu0 }
 0x222   : > { %v4995_v60 = vpop.f32.mrb[37].mxu0  ;;  %v6587_v61 = vpop.f32.mrb[36].mxu1 }
 0x223   : > { %v2311_v2 = vpop.f32.mrb[38].mxu0  ;;  %v5015_v62 = vpop.f32.mrb[37].mxu1 }
 0x224   : > { %v4996_v63 = vpop.f32.mrb[39].mxu0  ;;  %v2399_v0 = vpop.f32.mrb[38].mxu1 }
 0x225   : > { %v5016_v4 = vpop.f32.mrb[39].mxu1 }
 0x241   : > { %v6589_v3 = vpop.f32.mrb[40].mxu0 }
 0x242   : > { %v6591_v5 = vpop.f32.mrb[40].mxu1  ;;  %v5035_v6 = vpop.f32.mrb[41].mxu0 }
 0x243   : > { %v5055_v7 = vpop.f32.mrb[41].mxu1  ;;  %v2487_v8 = vpop.f32.mrb[42].mxu0 }
 0x244   : > { %v2575_v9 = vpop.f32.mrb[42].mxu1  ;;  %v5036_v10 = vpop.f32.mrb[43].mxu0  ;;  %v3222_v7 = vpack.c.bf16 %v6585_v18, %v6585_v18 }
 0x245   : > { %v5056_v11 = vpop.f32.mrb[43].mxu1 }
 0x261   : > { %v6593_v12 = vpop.f32.mrb[44].mxu0 }
 0x262   : > { %v6595_v13 = vpop.f32.mrb[44].mxu1  ;;  %v5075_v16 = vpop.f32.mrb[45].mxu0 }
 0x263   : > { %v5095_v27 = vpop.f32.mrb[45].mxu1  ;;  %v2663_v17 = vpop.f32.mrb[46].mxu0  ;;  %v3325_v16 = vsel %vm3231_vm2, %v3222_v7, 0  ;;  %v5476_v7 = vld [vmem:[%s6785_s4 + $0x10] sm:$0xff]  }
 0x264   : > { %v2751_v19 = vpop.f32.mrb[46].mxu1  ;;  %v5076_v20 = vpop.f32.mrb[47].mxu0  ;;  %v3223_v27 = vpack.c.bf16 %v6587_v61, %v6587_v61 }
 0x265   : > { %v5096_v21 = vpop.f32.mrb[47].mxu1 }
 0x26e   : > { %v2811_v28 = vpop.f32.mrb[48].mxu0 }
 0x26f   : > { %v2857_v22 = vpop.f32.mrb[48].mxu1  ;;  %v5101_v23 = vpop.f32.mrb[49].mxu0  ;;  %v3140_v24 = vsel %vm3139_vm3, %v2811_v28, -inf }
 0x270   : > { %v5107_v25 = vpop.f32.mrb[49].mxu1  ;;  %3141 = vmax.xlane.f32.xlu0 %v3140_v24  ;;  %v2814_v26 = vpop.f32.mrb[50].mxu0  ;;  %v3143_v32 = vsel %vm3139_vm3, %v2857_v22, -inf  ;;  %v3224_v24 = vpack.c.bf16 %v6589_v3, %v6589_v3 }
 0x271   : > { %v2860_v29 = vpop.f32.mrb[50].mxu1  ;;  %v5102_v30 = vpop.f32.mrb[51].mxu0 }
 0x272   : > { %v5108_v31 = vpop.f32.mrb[51].mxu1  ;;  %v3417_v30 = vsel %vm3231_vm2, %v3224_v24, 0 }
 0x273   : > { %v3225_v31 = vpack.c.bf16 %v6591_v5, %v6591_v5 }
 0x274   : > { %3144 = vmax.xlane.f32.xlu0 %v3143_v32 }
 0x27f   : > { %v2903_v33 = vpop.f32.mrb[52].mxu0 }
 0x280   : > { %v6599_v51 = vpop.f32.mrb[52].mxu1  ;;  %v5113_v34 = vpop.f32.mrb[53].mxu0  ;;  %v3146_v35 = vsel %vm3139_vm3, %v2903_v33, -inf }
 0x281   : > { %v5119_v36 = vpop.f32.mrb[53].mxu1  ;;  %3147 = vmax.xlane.f32.xlu1 %v3146_v35  ;;  %v2906_v37 = vpop.f32.mrb[54].mxu0  ;;  %v3149_v40 = vsel %vm3139_vm3, %v6599_v51, -inf }
 0x282   : > { %v2952_v52 = vpop.f32.mrb[54].mxu1  ;;  %v5114_v38 = vpop.f32.mrb[55].mxu0 }
 0x283   : > { %v5120_v39 = vpop.f32.mrb[55].mxu1  ;;  %v3226_v38 = vpack.c.bf16 %v6593_v12, %v6593_v12 }
 0x285   : > { %3150 = vmax.xlane.f32.xlu1 %v3149_v40  ;;  %v3227_v40 = vpack.c.bf16 %v6595_v13, %v6595_v13 }
 0x29f   : > { %v6604_v41 = vpop.f32.mrb[56].mxu0 }
 0x2a0   : > { %v6606_v42 = vpop.f32.mrb[56].mxu1  ;;  %v5125_v43 = vpop.f32.mrb[57].mxu0  ;;  %v3152_v44 = vsel %vm3139_vm3, %v6604_v41, -inf }
 0x2a1   : > { %v5131_v45 = vpop.f32.mrb[57].mxu1  ;;  %v3155_v46 = vsel %vm3139_vm3, %v6606_v42, -inf  ;;  %3153 = vmax.xlane.f32.xlu0 %v3152_v44  ;;  %v2998_v47 = vpop.f32.mrb[58].mxu0 }
 0x2a2   : > { %v3044_v14 = vpop.f32.mrb[58].mxu1  ;;  %3156 = vmax.xlane.f32.xlu1 %v3155_v46  ;;  %v5126_v48 = vpop.f32.mrb[59].mxu0  ;;  %v3555_v47 = vsel %vm3231_vm2, %v3227_v40, 0 }
 0x2a3   : > { %v5132_v49 = vpop.f32.mrb[59].mxu1 }
 0x2bf   : > { %v6612_v50 = vpop.f32.mrb[60].mxu0 }
 0x2c0   : > { %v6614_v15 = vpop.f32.mrb[60].mxu1  ;;  %v5137_v53 = vpop.f32.mrb[61].mxu0  ;;  %v3158_v54 = vsel %vm3139_vm3, %v6612_v50, -inf }
 0x2c1   : > { %v5143_v55 = vpop.f32.mrb[61].mxu1  ;;  %v3161_v56 = vsel %vm3139_vm3, %v6614_v15, -inf  ;;  %3159 = vmax.xlane.f32.xlu0 %v3158_v54  ;;  %v3090_v57 = vpop.f32.mrb[62].mxu0 }
 0x2c2   : > { %v3136_v58 = vpop.f32.mrb[62].mxu1  ;;  %3162 = vmax.xlane.f32.xlu1 %v3161_v56  ;;  %v5138_v59 = vpop.f32.mrb[63].mxu0 }
 0x2c3   : > { %v5144_v60 = vpop.f32.mrb[63].mxu1 }
 0x2fd   : > { %v3142_v2 = vpop.xlane.xlu0 %3141 }
 0x2fe   : > { %v3164_v62 = vsub.f32 %v2811_v28, %v3142_v2 }
 0x300   : > { %v3172_v63 = vmul.f32 1.442695, %v3164_v62 }
 0x301   : > { %v3145_v0 = vpop.xlane.xlu0 %3144 }
 0x302   : > { %5482 = vpow2.f32 %v3172_v63  ;;  %v3165_v4 = vsub.f32 %v2857_v22, %v3145_v0  ;;  %v3371_v22 = vsel %vm3231_vm2, %v3223_v27, 0 }
 0x304   : > { %v3174_v6 = vmul.f32 1.442695, %v3165_v4 }
 0x306   : > { %5484 = vpow2.f32 %v3174_v6 }
 0x30c   : > { %v5483_v8 = vpop.eup %5482 }
 0x30d   : > { %v3188_v9 = vsel %vm3139_vm3, %v5483_v8, 0.0  ;;  %v3212_v10 = vpack.c.bf16 %v5483_v8, %v5483_v8 }
 0x30e   : > { %v3148_v11 = vpop.xlane.xlu1 %3147  ;;  %3189 = vadd.xlane.f32.xlu0 %v3188_v9 }
 0x30f   : > { %v3166_v17 = vsub.f32 %v2903_v33, %v3148_v11  ;;  %5148 = vmatmul.mubr.msk.bf16.vlgmr.msra.gmra.mrb[64].mxu0 %vm3139_vm3, %v3212_v10 }
 0x310   : > { %v5485_v19 = vpop.eup %5484  ;;  %5158 = vmatpush3.bf16.msra.mxu0 %v3325_v16  ;;  %5159 = vmatprep.mubr.msk.bf16.mxu0 %vm5579_vm0, %v5578_v1 }
 0x311   : > { %v3176_v18 = vmul.f32 1.442695, %v3166_v17  ;;  %v3191_v20 = vsel %vm3139_vm3, %v5485_v19, 0.0  ;;  %v3213_v21 = vpack.c.bf16 %v5485_v19, %v5485_v19  ;;  %5169 = vmatprep.subr.bf16.mxu0 %v5578_v1 }
 0x312   : > { %3192 = vadd.xlane.f32.xlu1 %v3191_v20  ;;  %v3151_v28 = vpop.xlane.xlu1 %3150 }
 0x313   : > { %5486 = vpow2.f32 %v3176_v18  ;;  %v3167_v61 = vsub.f32 %v6599_v51, %v3151_v28  ;;  %5154 = vmatmul.mubr.msk.bf16.vlgmr.msra.gmra.mrb[64].mxu1 %vm3139_vm3, %v3213_v21  ;;  %v3463_v51 = vsel %vm3231_vm2, %v3225_v31, 0  ;;  %v5477_v18 = vld [vmem:[%s6785_s4 + $0x18] sm:$0xff]  }
 0x314   : > { %5164 = vmatpush3.bf16.msra.mxu1 %v3371_v22  ;;  %5165 = vmatprep.mubr.msk.bf16.mxu1 %vm5579_vm0, %v5578_v1 }
 0x315   : > { %v3178_v23 = vmul.f32 1.442695, %v3167_v61  ;;  %5175 = vmatprep.subr.bf16.mxu1 %v5578_v1 }
 0x317   : > { %5488 = vpow2.f32 %v3178_v23 }
 0x31d   : > { %v5487_v25 = vpop.eup %5486 }
 0x31e   : > { %v3194_v26 = vsel %vm3139_vm3, %v5487_v25, 0.0  ;;  %v3214_v29 = vpack.c.bf16 %v5487_v25, %v5487_v25 }
 0x31f   : > { %3195 = vadd.xlane.f32.xlu0 %v3194_v26  ;;  %v5478_v26 = vld [vmem:[%s6785_s4 + $0x20] sm:$0xff]  }
 0x320   : > { %5160 = vmatmul.mubr.msk.bf16.vlgmr.msra.gmra.mrb[68].mxu0 %vm3139_vm3, %v3214_v29 }
 0x321   : > { %v5489_v32 = vpop.eup %5488  ;;  %5170 = vmatpush3.bf16.msra.mxu0 %v3417_v30  ;;  %5171 = vmatprep.mubr.msk.bf16.mxu0 %vm5579_vm0, %v5578_v1 }
 0x322   : > { %v3197_v33 = vsel %vm3139_vm3, %v5489_v32, 0.0  ;;  %v3215_v3 = vpack.c.bf16 %v5489_v32, %v5489_v32  ;;  %5181 = vmatprep.subr.bf16.mxu0 %v5578_v1 }
 0x323   : > { %3198 = vadd.xlane.f32.xlu1 %v3197_v33 }
 0x324   : > { %5166 = vmatmul.mubr.msk.bf16.vlgmr.msra.gmra.mrb[68].mxu1 %vm3139_vm3, %v3215_v3 }
 0x325   : > { %5176 = vmatpush3.bf16.msra.mxu1 %v3463_v51  ;;  %5177 = vmatprep.mubr.msk.bf16.mxu1 %vm5579_vm0, %v5578_v1 }
 0x326   : > { %5187 = vmatprep.subr.bf16.mxu1 %v5578_v1 }
 0x32e   : > { %v3154_v5 = vpop.xlane.xlu0 %3153 }
 0x32f   : > { %v3157_v34 = vpop.xlane.xlu1 %3156  ;;  %v3168_v35 = vsub.f32 %v6604_v41, %v3154_v5  ;;  %v5479_v5 = vld [vmem:[%s6785_s4 + $0x28] sm:$0xff]  }
 0x330   : > { %v3169_v36 = vsub.f32 %v6606_v42, %v3157_v34  ;;  %v3509_v42 = vsel %vm3231_vm2, %v3226_v38, 0 }
 0x331   : > { %v3180_v37 = vmul.f32 1.442695, %v3168_v35 }
 0x332   : > { %v3182_v52 = vmul.f32 1.442695, %v3169_v36 }
 0x333   : > { %5490 = vpow2.f32 %v3180_v37 }
 0x334   : > { %5492 = vpow2.f32 %v3182_v52 }
 0x33d   : > { %v5491_v39 = vpop.eup %5490 }
 0x33e   : > { %v5493_v43 = vpop.eup %5492  ;;  %v3200_v44 = vsel %vm3139_vm3, %v5491_v39, 0.0  ;;  %v3216_v45 = vpack.c.bf16 %v5491_v39, %v5491_v39 }
 0x33f   : > { %v3203_v46 = vsel %vm3139_vm3, %v5493_v43, 0.0  ;;  %3201 = vadd.xlane.f32.xlu0 %v3200_v44  ;;  %v3217_v41 = vpack.c.bf16 %v5493_v43, %v5493_v43 }
 0x340   : > { %3204 = vadd.xlane.f32.xlu1 %v3203_v46  ;;  %5172 = vmatmul.mubr.msk.bf16.vlgmr.msra.gmra.mrb[72].mxu0 %vm3139_vm3, %v3216_v45 }
 0x341   : > { %5178 = vmatmul.mubr.msk.bf16.vlgmr.msra.gmra.mrb[72].mxu1 %vm3139_vm3, %v3217_v41  ;;  %5182 = vmatpush3.bf16.msra.mxu0 %v3509_v42  ;;  %v5480_v42 = vld [vmem:[%s6785_s4 + $0x30] sm:$0xff]  }
 0x342   : > { %5188 = vmatpush3.bf16.msra.mxu1 %v3555_v47  ;;  %5189 = vmatprep.mubr.msk.bf16.mxu1 %vm5579_vm0, %v5578_v1 }
 0x343   : > { %5183 = vmatprep.mubr.msk.bf16.mxu0 %vm5579_vm0, %v5578_v1  ;;  %5193 = vmatprep.subr.bf16.mxu0 %v5578_v1 }
 0x344   : > { %5199 = vmatprep.subr.bf16.mxu1 %v5578_v1 }
 0x34e   : > { %v3160_v12 = vpop.xlane.xlu0 %3159 }
 0x34f   : > { %v3163_v13 = vpop.xlane.xlu1 %3162  ;;  %v3170_v14 = vsub.f32 %v6612_v50, %v3160_v12  ;;  %v5474_v50 = vld [vmem:[%s6785_s4] sm:$0xff]  }
 0x350   : > { %v3171_v48 = vsub.f32 %v6614_v15, %v3163_v13  ;;  %v5475_v15 = vld [vmem:[%s6785_s4 + $0x8] sm:$0xff]  }
 0x351   : > { %v3184_v49 = vmul.f32 1.442695, %v3170_v14  ;;  %v5481_v14 = vld [vmem:[%s6785_s4 + $0x38] sm:$0xff]  }
 0x352   : > { %v3186_v53 = vmul.f32 1.442695, %v3171_v48 }
 0x353   : > { %5494 = vpow2.f32 %v3184_v49 }
 0x354   : > { %5496 = vpow2.f32 %v3186_v53 }
 0x35d   : > { %v5495_v54 = vpop.eup %5494 }
 0x35e   : > { %v5497_v55 = vpop.eup %5496  ;;  %v3206_v56 = vsel %vm3139_vm3, %v5495_v54, 0.0  ;;  %v3218_v57 = vpack.c.bf16 %v5495_v54, %v5495_v54 }
 0x35f   : > { %v3209_v58 = vsel %vm3139_vm3, %v5497_v55, 0.0  ;;  %3207 = vadd.xlane.f32.xlu0 %v3206_v56  ;;  %v3219_v59 = vpack.c.bf16 %v5497_v55, %v5497_v55 }
 0x360   : > { %3210 = vadd.xlane.f32.xlu1 %v3209_v58  ;;  %5184 = vmatmul.mubr.msk.bf16.vlgmr.msra.gmra.mrb[76].mxu0 %vm3139_vm3, %v3218_v57 }
 0x361   : > { %5190 = vmatmul.mubr.msk.bf16.vlgmr.msra.gmra.mrb[76].mxu1 %vm3139_vm3, %v3219_v59  ;;  %5195 = vmatprep.mubr.msk.bf16.mxu0 %vm5579_vm0, %v5578_v1 }
 0x362   : > { %5201 = vmatprep.mubr.msk.bf16.mxu1 %vm5579_vm0, %v5578_v1  ;;  %5194 = vmatpush3.bf16.msra.mxu0 %v5474_v50 }
 0x363   : > { %5205 = vmatprep.subr.bf16.mxu0 %v5578_v1  ;;  %5200 = vmatpush3.bf16.msra.mxu1 %v5475_v15 }
 0x364   : > { %5211 = vmatprep.subr.bf16.mxu1 %v5578_v1 }
 0x39b   : > { %v3190_v60 = vpop.xlane.xlu0 %3189 }
 0x39c   : > { %5498 = vrcp.f32 %v3190_v60 }
 0x39f   : > { %v3193_v2 = vpop.xlane.xlu1 %3192 }
 0x3a0   : > { %5500 = vrcp.f32 %v3193_v2 }
 0x3a6   : > { %v5499_v62 = vpop.eup %5498 }
 0x3aa   : > { %v5501_v10 = vpop.eup %5500 }
 0x3ac   : > { %v3196_v11 = vpop.xlane.xlu0 %3195 }
 0x3ad   : > { %5502 = vrcp.f32 %v3196_v11 }
 0x3b0   : > { %v3199_v28 = vpop.xlane.xlu1 %3198 }
 0x3b1   : > { %5504 = vrcp.f32 %v3199_v28 }
 0x3b7   : > { %v5503_v22 = vpop.eup %5502 }
 0x3bb   : > { %v5505_v31 = vpop.eup %5504 }
 0x3cc   : > { %v3202_v36 = vpop.xlane.xlu0 %3201 }
 0x3cd   : > { %v3205_v37 = vpop.xlane.xlu1 %3204  ;;  %5506 = vrcp.f32 %v3202_v36 }
 0x3ce   : > { %5508 = vrcp.f32 %v3205_v37 }
 0x3d7   : > { %v5507_v52 = vpop.eup %5506 }
 0x3d8   : > { %v5509_v39 = vpop.eup %5508 }
 0x3e2   : > { %v3269_v63 = vpop.f32.mrb[64].mxu0 }
 0x3e3   : > { %v3605_v0 = vmul.f32 %v5499_v62, %v3269_v63  ;;  %v5149_v4 = vpop.f32.mrb[65].mxu0 }
 0x3e4   : > { %v3272_v6 = vpop.f32.mrb[66].mxu0 }
 0x3e5   : > { %v3613_v8 = vpack.c.bf16 %v3605_v0, %v3605_v0  ;;  %v5150_v9 = vpop.f32.mrb[67].mxu0 }
 0x3e6   : > { %v3315_v16 = vpop.f32.mrb[64].mxu1 }
 0x3e7   : > { %v3606_v27 = vmul.f32 %v5501_v10, %v3315_v16  ;;  %v5155_v17 = vpop.f32.mrb[65].mxu1  ;;  %5196 = vmatmul.mubr.msk.bf16.vlgmr.msra.gmra.mrb[80].mxu0 %vm2770_vm1, %v3613_v8 }
 0x3e8   : > { %v3318_v19 = vpop.f32.mrb[66].mxu1  ;;  %5206 = vmatpush3.bf16.msra.mxu0 %v5476_v7  ;;  %5207 = vmatprep.mubr.msk.bf16.mxu0 %vm5579_vm0, %v5578_v1 }
 0x3e9   : > { %v3614_v20 = vpack.c.bf16 %v3606_v27, %v3606_v27  ;;  %v5156_v21 = vpop.f32.mrb[67].mxu1  ;;  %5217 = vmatprep.subr.bf16.mxu0 %v5578_v1 }
 0x3eb   : > { %5202 = vmatmul.mubr.msk.bf16.vlgmr.msra.gmra.mrb[80].mxu1 %vm2770_vm1, %v3614_v20 }
 0x3ec   : > { %5212 = vmatpush3.bf16.msra.mxu1 %v5477_v18  ;;  %5213 = vmatprep.mubr.msk.bf16.mxu1 %vm5579_vm0, %v5578_v1  ;;  %v3208_v53 = vpop.xlane.xlu0 %3207 }
 0x3ed   : > { %5223 = vmatprep.subr.bf16.mxu1 %v5578_v1  ;;  %v3211_v54 = vpop.xlane.xlu1 %3210  ;;  %5510 = vrcp.f32 %v3208_v53 }
 0x3ee   : > { %5512 = vrcp.f32 %v3211_v54 }
 0x3f3   : > { %v3361_v61 = vpop.f32.mrb[68].mxu0 }
 0x3f4   : > { %v3607_v23 = vmul.f32 %v5503_v22, %v3361_v61  ;;  %v5161_v24 = vpop.f32.mrb[69].mxu0 }
 0x3f5   : > { %v3364_v25 = vpop.f32.mrb[70].mxu0 }
 0x3f6   : > { %v3615_v29 = vpack.c.bf16 %v3607_v23, %v3607_v23  ;;  %v5162_v30 = vpop.f32.mrb[71].mxu0 }
 0x3f7   : > { %v3407_v32 = vpop.f32.mrb[68].mxu1  ;;  %v5511_v55 = vpop.eup %5510 }
 0x3f8   : > { %v3608_v33 = vmul.f32 %v5505_v31, %v3407_v32  ;;  %v5167_v3 = vpop.f32.mrb[69].mxu1  ;;  %5208 = vmatmul.mubr.msk.bf16.vlgmr.msra.gmra.mrb[84].mxu0 %vm2770_vm1, %v3615_v29  ;;  %v5513_v57 = vpop.eup %5512 }
 0x3f9   : > { %v3410_v51 = vpop.f32.mrb[70].mxu1  ;;  %5218 = vmatpush3.bf16.msra.mxu0 %v5478_v26  ;;  %5219 = vmatprep.mubr.msk.bf16.mxu0 %vm5579_vm0, %v5578_v1 }
 0x3fa   : > { %v3616_v34 = vpack.c.bf16 %v3608_v33, %v3608_v33  ;;  %v5168_v35 = vpop.f32.mrb[71].mxu1  ;;  %5229 = vmatprep.subr.bf16.mxu0 %v5578_v1 }
 0x3fc   : > { %5214 = vmatmul.mubr.msk.bf16.vlgmr.msra.gmra.mrb[84].mxu1 %vm2770_vm1, %v3616_v34 }
 0x3fd   : > { %5224 = vmatpush3.bf16.msra.mxu1 %v5479_v5  ;;  %5225 = vmatprep.mubr.msk.bf16.mxu1 %vm5579_vm0, %v5578_v1 }
 0x3fe   : > { %5235 = vmatprep.subr.bf16.mxu1 %v5578_v1 }
 0x413   : > { %v3453_v38 = vpop.f32.mrb[72].mxu0 }
 0x414   : > { %v3609_v40 = vmul.f32 %v5507_v52, %v3453_v38  ;;  %v3499_v43 = vpop.f32.mrb[72].mxu1  ;;  %v5173_v44 = vpop.f32.mrb[73].mxu0  ;;  %v4348_v38 = vld [vmem:[%s6786_s5] ss:$0 sm:$0xff] }
 0x415   : > { %v3610_v45 = vmul.f32 %v5509_v39, %v3499_v43  ;;  %v5179_v46 = vpop.f32.mrb[73].mxu1  ;;  %v3456_v41 = vpop.f32.mrb[74].mxu0 }
 0x416   : > { %v3617_v47 = vpack.c.bf16 %v3609_v40, %v3609_v40  ;;  %v3502_v12 = vpop.f32.mrb[74].mxu1  ;;  %v5174_v13 = vpop.f32.mrb[75].mxu0 }
 0x417   : > { %v3618_v48 = vpack.c.bf16 %v3610_v45, %v3610_v45  ;;  %v5180_v49 = vpop.f32.mrb[75].mxu1 }
 0x418   : > { %5220 = vmatmul.mubr.msk.bf16.vlgmr.msra.gmra.mrb[88].mxu0 %vm2770_vm1, %v3617_v47 }
 0x419   : > { %5226 = vmatmul.mubr.msk.bf16.vlgmr.msra.gmra.mrb[88].mxu1 %vm2770_vm1, %v3618_v48  ;;  %5230 = vmatpush3.bf16.msra.mxu0 %v5480_v42 }
 0x41a   : > { %5236 = vmatpush3.bf16.msra.mxu1 %v5481_v14  ;;  %5231 = vmatprep.mubr.msk.bf16.mxu0 %vm5579_vm0, %v5578_v1 }
 0x41b   : > { %5237 = vmatprep.mubr.msk.bf16.mxu1 %vm5579_vm0, %v5578_v1 }
 0x433   : > { %v3545_v56 = vpop.f32.mrb[76].mxu0 }
 0x434   : > { %v3611_v58 = vmul.f32 %v5511_v55, %v3545_v56  ;;  %v3591_v59 = vpop.f32.mrb[76].mxu1  ;;  %v5185_v50 = vpop.f32.mrb[77].mxu0 }
 0x435   : > { %v3612_v15 = vmul.f32 %v5513_v57, %v3591_v59  ;;  %v5191_v60 = vpop.f32.mrb[77].mxu1  ;;  %v3548_v2 = vpop.f32.mrb[78].mxu0 }
 0x436   : > { %v3619_v62 = vpack.c.bf16 %v3611_v58, %v3611_v58  ;;  %v3594_v63 = vpop.f32.mrb[78].mxu1  ;;  %v5186_v0 = vpop.f32.mrb[79].mxu0 }
 0x437   : > { %v3620_v4 = vpack.c.bf16 %v3612_v15, %v3612_v15  ;;  %v5192_v6 = vpop.f32.mrb[79].mxu1 }
 0x438   : > { %5232 = vmatmul.mubr.msk.bf16.vlgmr.msra.gmra.mrb[92].mxu0 %vm2770_vm1, %v3619_v62 }
 0x439   : > { %5238 = vmatmul.mubr.msk.bf16.vlgmr.msra.gmra.mrb[92].mxu1 %vm2770_vm1, %v3620_v4 }
 0x4ba   : > { %v3680_v1 = vpop.f32.mrb[80].mxu0 }
 0x4bb   : > { %v5197_v7 = vpop.f32.mrb[81].mxu0 }
 0x4bc   : > { %v3683_v8 = vpop.f32.mrb[82].mxu0 }
 0x4bd   : > { %v5198_v9 = vpop.f32.mrb[83].mxu0 }
 0x4be   : > { %v3729_v10 = vpop.f32.mrb[80].mxu1 }
 0x4bf   : > { %v4029_v11 = vadd.f32 %v3729_v10, %v3680_v1  ;;  %v5203_v16 = vpop.f32.mrb[81].mxu1 }
 0x4c0   : > { %v3732_v27 = vpop.f32.mrb[82].mxu1 }
 0x4c1   : > { %v5204_v17 = vpop.f32.mrb[83].mxu1 }
 0x4cb   : > { %v3778_v19 = vpop.f32.mrb[84].mxu0 }
 0x4cc   : > { %v4030_v18 = vadd.f32 %v4029_v11, %v3778_v19  ;;  %v5209_v20 = vpop.f32.mrb[85].mxu0 }
 0x4cd   : > { %v3781_v21 = vpop.f32.mrb[86].mxu0 }
 0x4ce   : > { %v5210_v28 = vpop.f32.mrb[87].mxu0 }
 0x4cf   : > { %v3827_v22 = vpop.f32.mrb[84].mxu1 }
 0x4d0   : > { %v4031_v61 = vadd.f32 %v4030_v18, %v3827_v22  ;;  %v5215_v23 = vpop.f32.mrb[85].mxu1 }
 0x4d1   : > { %v3830_v24 = vpop.f32.mrb[86].mxu1 }
 0x4d2   : > { %v5216_v25 = vpop.f32.mrb[87].mxu1 }
 0x4eb   : > { %v3876_v26 = vpop.f32.mrb[88].mxu0 }
 0x4ec   : > { %v4032_v29 = vadd.f32 %v4031_v61, %v3876_v26  ;;  %v3925_v30 = vpop.f32.mrb[88].mxu1  ;;  %v5221_v31 = vpop.f32.mrb[89].mxu0 }
 0x4ed   : > { %v5227_v32 = vpop.f32.mrb[89].mxu1  ;;  %v3879_v33 = vpop.f32.mrb[90].mxu0 }
 0x4ee   : > { %v4033_v3 = vadd.f32 %v4032_v29, %v3925_v30  ;;  %v3928_v51 = vpop.f32.mrb[90].mxu1  ;;  %v5222_v5 = vpop.f32.mrb[91].mxu0 }
 0x4ef   : > { %v5228_v34 = vpop.f32.mrb[91].mxu1 }
 0x50b   : > { %v3974_v35 = vpop.f32.mrb[92].mxu0 }
 0x50c   : > { %v4034_v36 = vadd.f32 %v4033_v3, %v3974_v35  ;;  %v4023_v37 = vpop.f32.mrb[92].mxu1  ;;  %v5233_v52 = vpop.f32.mrb[93].mxu0 }
 0x50d   : > { %v5239_v39 = vpop.f32.mrb[93].mxu1  ;;  %v3977_v40 = vpop.f32.mrb[94].mxu0 }
 0x50e   : > { %v4035_v43 = vadd.f32 %v4034_v36, %v4023_v37  ;;  %v4026_v44 = vpop.f32.mrb[94].mxu1  ;;  %v5234_v45 = vpop.f32.mrb[95].mxu0 }
 0x50f   : > { %v5240_v46 = vpop.f32.mrb[95].mxu1 }
 0x510   : > { %v4043_v41 = vadd.f32 %v4348_v38, %v4035_v43 }
 0x512   : > { %4044 = vst [vmem:[%s242_s14] sm:$0xff] %v4043_v41 }
 0x513   : > { %5527 = shalt.err (!%p5524_p3)
}
 0x514   : > { %s5528_s29 = scalar_lea.hbm %s6739_s18, 128  ;;  %s5532_s11 = scalar_lea.hbm %s6787_s6, 256 }
 0x515   : > { %p5529_p4 = scmp.ne.s32.totalorder %s6739_s18, %s5528_s29  ;;  %p5533_p9 = scmp.lt.u32.totalorder %s6739_s18, %s6787_s6 }
 0x516   : > { %p5534_p10 = scmp.lt.u32.totalorder %s5532_s11, %s5528_s29  ;;  %p5536_p12 = scmp.lt.u32.totalorder %s5528_s29, %s6739_s18 }
 0x517   : > { %p5530_p7 = pnand %p5529_p4, %p5654_p5 }
 0x518   : > { %p5535_p11 = por %p5534_p10, %p5533_p9 }
 0x519   : > { %p5531_p8 = pneg %p5530_p7 }
 0x51a   : > { %p5537_p13 = por %p5536_p12, %p5535_p11 }
 0x51c   : > { %p5538_p0 = pnand %p5537_p13, %p5531_p8 }
 0x51e   : > { %5541 = shalt.err (!%p5538_p0)
}
 0x51f   : > { %5241 = dma.vmem_to_hbm [thread:$0]  (%p5654_p5), %s6741_s15, 128, %s6739_s18, %s4046_s19  }
 0x520 PF: > { %p5247_p1 = scmp.ge.s32.totalorder %s5576_s24, 2  ;;  %s4071_s14 = sand.u32 1, %s5564_s21  }
 0x521   : > { %s4072_s16 = scalar_lea.sflag [#allocation3], %s4071_s14 }
 0x522   : > { %p5244_p2 = pnand %p5247_p1, %p5658_p6 }
 0x524   : > { %5559 = dma.done.wait (!%p5244_p2), %s4072_s16, 128  }
 0x525   : > { %5561 = vsyncadd (!%p5244_p2), %s4072_s16, 4294967168  ;;  %p16_p3 = scmp.ge.s32.totalorder %s5641_s27, 4   ;;  %s6790_s21 = smov %s5568_s22 }
 0x526   : > { %s6791_s22 = smov %s5572_s23  ;;  %s6792_s23 = smov %s5652_s30 }
 0x527   : > { %s6793_s24 = smov %s5641_s27  ;;  %18 = sbr.rel (!%p16_p3) target bundleno = 3 (0x3), region = 79 }
 0x52e   :  { %4077 = vsyncpa [#allocation3], 1 }
 0x52f   :  { %4079 = vsyncpa [#allocation3 + $0x1], 1 }

</bundles_post_ra>
